<compile_context>
chip_gen: v6e
topology: v6e:2x2x1
jax: 0.10.0
libtpu: 0.0.40
codegen_flags: <defaults>
</compile_context>

<pallas_src>
import functools

import jax
import jax.numpy as jnp
from jax import lax
from jax.experimental import pallas as pl
from jax.experimental.pallas import tpu as pltpu

_PI = 3.141592653589793
_PI_2 = 1.5707963267948966
_PI_4 = 0.7853981633974483
_TAN_PI_8 = 0.4142135623730951
_FLT_MIN = 1.1754943508222875e-38


def _recip(x):
    # EUP approximate reciprocal (free slot) + one Newton-Raphson refinement
    # step (2 VALU ops) -> full float32 accuracy without a serialized divide.
    r0 = pl.reciprocal(x, approx=True)
    return r0 * (2.0 - x * r0)


def _atan2(y, x):
    # Octant reduction: t = min(|x|,|y|) / max(|x|,|y|) in [0, 1], then the
    # Cephes single-precision atan polynomial on |w| <= tan(pi/8).
    ax = jnp.abs(x)
    ay = jnp.abs(y)
    mx = jnp.maximum(ax, ay)
    mn = jnp.minimum(ax, ay)
    t = mn * _recip(jnp.maximum(mx, _FLT_MIN))        # guards atan2(0, 0) = 0

    mid = t > _TAN_PI_8
    w = jnp.where(mid, (t - 1.0) * _recip(t + 1.0), t)
    z = w * w
    p = ((8.05374449538e-2 * z - 1.38776856032e-1) * z
         + 1.99777106478e-1) * z - 3.33329491539e-1
    p = p * z * w + w
    p = p + jnp.where(mid, _PI_4, 0.0)                # atan(t), t in [0, 1]

    # Flat quadrant / sign fixups (3 selects, no nesting).
    p = jnp.where(ay > ax, _PI_2 - p, p)
    p = jnp.where(x < 0.0, _PI - p, p)
    # TODO(synk): y == -0.0 with x < 0 returns +pi (IEEE/torch give -pi).
    return jnp.where(y < 0.0, -p, p)


def _polarnet_kernel(params_ref, x_ref, y_ref, out_ref, *, slab_rows):
    # params_ref: SMEM (5, H)  rows = [w1_r, w1_a, b1, w2, b2*ones]
    # x_ref/y_ref: VMEM (tile_rows, 128)   lane-dense batch planes
    # out_ref:     VMEM (tile_rows, 128)   lane-dense output tile
    num_hid = params_ref.shape[1]
    tile_rows = out_ref.shape[0]
    n_slabs = tile_rows // slab_rows                  # static

    def slab(s, carry):
        row = pl.multiple_of(s * slab_rows, slab_rows)
        x = x_ref[pl.ds(row, slab_rows), :]           # (slab_rows, 128)
        y = y_ref[pl.ds(row, slab_rows), :]
        r = jnp.sqrt(x * x + y * y)
        a = _atan2(y, x)

        # Fused Linear(2,H) + tanh + Linear(H,1): accumulate over hidden
        # units with SMEM-scalar weights; the (slab, H) hidden tensor never
        # exists, so no h store/reload traffic at all.
        acc = jnp.zeros_like(r)
        for hh in range(num_hid):                     # unrolled, H is static
            w_r = params_ref[0, hh]
            w_a = params_ref[1, hh]
            b_h = params_ref[2, hh]
            w_o = params_ref[3, hh]
            acc = acc + w_o * jnp.tanh(w_r * r + w_a * a + b_h)

        b2 = params_ref[4, 0]
        out_ref[pl.ds(row, slab_rows), :] = (
            jax.nn.sigmoid(acc + b2).astype(out_ref.dtype))
        return carry

    # Strip-mine the tile: keeps vreg pressure bounded regardless of tile
    # size while the grid tile amortizes the per-step pipeline overhead.
    lax.fori_loop(0, n_slabs, slab, 0)


def _round_up(v, m):
    return -(-v // m) * m


def _pick_slab(tile_rows):
    # Largest slab in {64,32,16,8} rows that divides the tile (tile is a
    # multiple of 8 by construction).  64 rows = 8 vregs per quantity, the
    # same working set the validated v2 kernel used per step.
    for s in (64, 32, 16, 8):
        if tile_rows % s == 0:
            return s
    return 8


@functools.partial(jax.jit, static_argnames=("tile_rows",))
def polarnet_forward(inp, w1, b1, w2, b2, *, tile_rows=512):
    """inp: (N, 2); w1: (2, H); b1: (1, H); w2: (H, 1); b2: (1, 1) -> (N, 1)."""
    n = inp.shape[0]
    num_hid = w1.shape[1]

    # Pack all parameters into one small SMEM-resident table (single DMA,
    # resident for the whole grid).
    params = jnp.concatenate(
        [w1[0:1, :], w1[1:2, :], b1.reshape(1, -1), w2.reshape(1, -1),
         jnp.broadcast_to(b2.reshape(1, 1), (1, num_hid))],
        axis=0).astype(jnp.float32)                   # (5, H)

    # Lane-dense batch layout: rows of 128 samples, grid tiles of `tr` rows.
    # Clamp so the grid has >= 2 steps whenever the batch allows it (v7x
    # megacore); on single-TC chips the clamp only avoids useless padding.
    rows = _round_up(n, 128) // 128                   # ceil(n / 128)
    tr = max(8, min(_round_up(tile_rows, 8), _round_up(-(-rows // 2), 8)))
    slab_rows = _pick_slab(tr)
    rows_pad = _round_up(rows, tr)
    npad = rows_pad * 128
    grid = (rows_pad // tr,)

    # Pad + column split fuse into a single HBM pass under this jit.
    inp_pad = jnp.pad(inp.astype(jnp.float32), ((0, npad - n), (0, 0)))
    x_plane = inp_pad[:, 0].reshape(rows_pad, 128)
    y_plane = inp_pad[:, 1].reshape(rows_pad, 128)

    elems = rows_pad * 128
    out2d = pl.pallas_call(
        functools.partial(_polarnet_kernel, slab_rows=slab_rows),
        out_shape=jax.ShapeDtypeStruct((rows_pad, 128), jnp.float32),
        grid=grid,
        in_specs=[
            pl.BlockSpec(memory_space=pltpu.MemorySpace.SMEM),      # params
            pl.BlockSpec((tr, 128), lambda i: (i, 0)),              # x plane
            pl.BlockSpec((tr, 128), lambda i: (i, 0)),              # y plane
        ],
        out_specs=pl.BlockSpec((tr, 128), lambda i: (i, 0)),
        compiler_params=pltpu.CompilerParams(
            dimension_semantics=("parallel",)),       # lets v7x use both TCs
        cost_estimate=pl.CostEstimate(
            flops=220 * elems,
            transcendentals=37 * elems,
            bytes_accessed=12 * elems),
    )(params, x_plane, y_plane)

    if npad == n:                                     # aligned: slice elided
        return out2d.reshape(n, 1)
    return out2d.reshape(-1)[:n].reshape(n, 1)


def _init_params(key, num_hid):
    # PyTorch Linear default init: U(-1/sqrt(fan_in), +1/sqrt(fan_in)).
    k1, k2, k3, k4 = jax.random.split(key, 4)
    bound1 = 1.0 / jnp.sqrt(2.0)
    bound2 = 1.0 / jnp.sqrt(float(num_hid))
    w1 = jax.random.uniform(k1, (2, num_hid), jnp.float32, -bound1, bound1)
    b1 = jax.random.uniform(k2, (1, num_hid), jnp.float32, -bound1, bound1)
    w2 = jax.random.uniform(k3, (num_hid, 1), jnp.float32, -bound2, bound2)
    b2 = jax.random.uniform(k4, (1, 1), jnp.float32, -bound2, bound2)
    return w1, b1, w2, b2


def _reference(inp, w1, b1, w2, b2):
    x, y = inp[:, 0], inp[:, 1]
    r = jnp.sqrt(x ** 2 + y ** 2)
    a = jnp.arctan2(y, x)
    f = jnp.stack([r, a], axis=1)
    h = jnp.tanh(f @ w1 + b1)
    return jax.nn.sigmoid(h @ w2 + b2)


if __name__ == "__main__":
    key = jax.random.PRNGKey(0)
    k_par, k0, k1, k2, k3 = jax.random.split(key, 5)

    H = 32
    w1, b1, w2, b2 = _init_params(k_par, H)

    checks = [
        (k0, 8),       # module-spec toy shape (batch=8, num_hid=32), grid=1
        (k1, 2048),    # 2 grid steps (both v7x TensorCores), slab=8 path
        (k2, 40964),   # non-multiple-of-128 batch: padded tail, multi-slab
        (k3, 81920),   # slab=64 strip-mine path, 2 grid steps
    ]
    for kk, n in checks:
        inp = jax.random.normal(kk, (n, 2), jnp.float32)
        out = jax.block_until_ready(polarnet_forward(inp, w1, b1, w2, b2))
        ref = _reference(inp, w1, b1, w2, b2)
        assert out.shape == (n, 1), (n, out.shape)
        assert jnp.allclose(out, ref, atol=1e-4, rtol=1e-4), n

    print("KERNEL_OK")
</pallas_src>

<mosaic_0001>
module attributes {stable_mosaic.version = 11 : i64} {
  func.func @_polarnet_kernel(%arg0: i32, %arg1: memref<5x32xf32, #tpu.memory_space<smem>>, %arg2: memref<8x128xf32, #tpu.memory_space<vmem>>, %arg3: memref<8x128xf32, #tpu.memory_space<vmem>>, %arg4: memref<8x128xf32, #tpu.memory_space<vmem>>) attributes {dimension_semantics = [#tpu.dimension_semantics<parallel>], iteration_bounds = array<i64: 1>, scalar_prefetch = 0 : i64, scratch_operands = 0 : i64, tpu.core_type = #tpu.core_type<tc>, window_params = [{transform_indices = @transform_0, window_bounds = array<i64: 5, 32>}, {transform_indices = @transform_1, window_bounds = array<i64: 8, 128>}, {transform_indices = @transform_2, window_bounds = array<i64: 8, 128>}, {transform_indices = @transform_3, window_bounds = array<i64: 8, 128>}]} {
    %c0_i32 = arith.constant 0 : i32
    %c8_i32 = arith.constant 8 : i32
    %0 = arith.muli %c0_i32, %c8_i32 : i32
    %1 = tpu.assume_multiple %0, 8 : i32
    %2 = arith.index_cast %1 : i32 to index
    %c0 = arith.constant 0 : index
    %3 = vector.load %arg2[%2, %c0] : memref<8x128xf32, #tpu.memory_space<vmem>>, vector<8x128xf32>
    %4 = arith.index_cast %1 : i32 to index
    %c0_0 = arith.constant 0 : index
    %5 = vector.load %arg3[%4, %c0_0] : memref<8x128xf32, #tpu.memory_space<vmem>>, vector<8x128xf32>
    %6 = arith.mulf %3, %3 : vector<8x128xf32>
    %7 = arith.mulf %5, %5 : vector<8x128xf32>
    %8 = arith.addf %6, %7 : vector<8x128xf32>
    %9 = math.sqrt %8 : vector<8x128xf32>
    %10 = math.absf %3 : vector<8x128xf32>
    %11 = math.absf %5 : vector<8x128xf32>
    %12 = arith.maximumf %10, %11 : vector<8x128xf32>
    %13 = arith.minimumf %10, %11 : vector<8x128xf32>
    %cst = arith.constant 1.17549435E-38 : f32
    %14 = vector.broadcast %cst : f32 to vector<8x128xf32>
    %15 = arith.maximumf %12, %14 : vector<8x128xf32>
    %16 = tpu.reciprocal %15 {approx = true} : vector<8x128xf32> -> vector<8x128xf32>
    %17 = arith.mulf %15, %16 : vector<8x128xf32>
    %cst_1 = arith.constant 2.000000e+00 : f32
    %18 = vector.broadcast %cst_1 : f32 to vector<8x128xf32>
    %19 = arith.subf %18, %17 : vector<8x128xf32>
    %20 = arith.mulf %16, %19 : vector<8x128xf32>
    %21 = arith.mulf %13, %20 : vector<8x128xf32>
    %cst_2 = arith.constant 0.414213568 : f32
    %22 = vector.broadcast %cst_2 : f32 to vector<8x128xf32>
    %23 = arith.cmpf ogt, %21, %22 : vector<8x128xf32>
    %cst_3 = arith.constant 1.000000e+00 : f32
    %24 = vector.broadcast %cst_3 : f32 to vector<8x128xf32>
    %25 = arith.subf %21, %24 : vector<8x128xf32>
    %cst_4 = arith.constant 1.000000e+00 : f32
    %26 = vector.broadcast %cst_4 : f32 to vector<8x128xf32>
    %27 = arith.addf %21, %26 : vector<8x128xf32>
    %28 = tpu.reciprocal %27 {approx = true} : vector<8x128xf32> -> vector<8x128xf32>
    %29 = arith.mulf %27, %28 : vector<8x128xf32>
    %cst_5 = arith.constant 2.000000e+00 : f32
    %30 = vector.broadcast %cst_5 : f32 to vector<8x128xf32>
    %31 = arith.subf %30, %29 : vector<8x128xf32>
    %32 = arith.mulf %28, %31 : vector<8x128xf32>
    %33 = arith.mulf %25, %32 : vector<8x128xf32>
    %34 = arith.select %23, %33, %21 : vector<8x128xi1>, vector<8x128xf32>
    %35 = arith.mulf %34, %34 : vector<8x128xf32>
    %cst_6 = arith.constant 0.0805374458 : f32
    %36 = vector.broadcast %cst_6 : f32 to vector<8x128xf32>
    %37 = arith.mulf %36, %35 : vector<8x128xf32>
    %cst_7 = arith.constant 0.138776854 : f32
    %38 = vector.broadcast %cst_7 : f32 to vector<8x128xf32>
    %39 = arith.subf %37, %38 : vector<8x128xf32>
    %40 = arith.mulf %39, %35 : vector<8x128xf32>
    %cst_8 = arith.constant 0.199777111 : f32
    %41 = vector.broadcast %cst_8 : f32 to vector<8x128xf32>
    %42 = arith.addf %40, %41 : vector<8x128xf32>
    %43 = arith.mulf %42, %35 : vector<8x128xf32>
    %cst_9 = arith.constant 0.333329499 : f32
    %44 = vector.broadcast %cst_9 : f32 to vector<8x128xf32>
    %45 = arith.subf %43, %44 : vector<8x128xf32>
    %46 = arith.mulf %45, %35 : vector<8x128xf32>
    %47 = arith.mulf %46, %34 : vector<8x128xf32>
    %48 = arith.addf %47, %34 : vector<8x128xf32>
    %cst_10 = arith.constant 0.785398185 : f32
    %cst_11 = arith.constant 0.000000e+00 : f32
    %49 = vector.broadcast %cst_10 : f32 to vector<8x128xf32>
    %50 = vector.broadcast %cst_11 : f32 to vector<8x128xf32>
    %51 = arith.select %23, %49, %50 : vector<8x128xi1>, vector<8x128xf32>
    %52 = arith.addf %48, %51 : vector<8x128xf32>
    %53 = arith.cmpf ogt, %11, %10 : vector<8x128xf32>
    %cst_12 = arith.constant 1.57079637 : f32
    %54 = vector.broadcast %cst_12 : f32 to vector<8x128xf32>
    %55 = arith.subf %54, %52 : vector<8x128xf32>
    %56 = arith.select %53, %55, %52 : vector<8x128xi1>, vector<8x128xf32>
    %cst_13 = arith.constant 0.000000e+00 : f32
    %57 = vector.broadcast %cst_13 : f32 to vector<8x128xf32>
    %58 = arith.cmpf olt, %3, %57 : vector<8x128xf32>
    %cst_14 = arith.constant 3.14159274 : f32
    %59 = vector.broadcast %cst_14 : f32 to vector<8x128xf32>
    %60 = arith.subf %59, %56 : vector<8x128xf32>
    %61 = arith.select %58, %60, %56 : vector<8x128xi1>, vector<8x128xf32>
    %cst_15 = arith.constant 0.000000e+00 : f32
    %62 = vector.broadcast %cst_15 : f32 to vector<8x128xf32>
    %63 = arith.cmpf olt, %5, %62 : vector<8x128xf32>
    %cst_16 = arith.constant 0.000000e+00 : f32
    %64 = vector.broadcast %cst_16 : f32 to vector<8x128xf32>
    %65 = arith.subf %64, %61 : vector<8x128xf32>
    %66 = arith.select %63, %65, %61 : vector<8x128xi1>, vector<8x128xf32>
    %cst_17 = arith.constant 0.000000e+00 : f32
    %67 = vector.broadcast %cst_17 : f32 to vector<8x128xf32>
    %c0_18 = arith.constant 0 : index
    %c0_19 = arith.constant 0 : index
    %68 = memref.load %arg1[%c0_18, %c0_19] : memref<5x32xf32, #tpu.memory_space<smem>>
    %c1 = arith.constant 1 : index
    %c0_20 = arith.constant 0 : index
    %69 = memref.load %arg1[%c1, %c0_20] : memref<5x32xf32, #tpu.memory_space<smem>>
    %c2 = arith.constant 2 : index
    %c0_21 = arith.constant 0 : index
    %70 = memref.load %arg1[%c2, %c0_21] : memref<5x32xf32, #tpu.memory_space<smem>>
    %c3 = arith.constant 3 : index
    %c0_22 = arith.constant 0 : index
    %71 = memref.load %arg1[%c3, %c0_22] : memref<5x32xf32, #tpu.memory_space<smem>>
    %72 = vector.broadcast %68 : f32 to vector<8x128xf32>
    %73 = arith.mulf %72, %9 : vector<8x128xf32>
    %74 = vector.broadcast %69 : f32 to vector<8x128xf32>
    %75 = arith.mulf %74, %66 : vector<8x128xf32>
    %76 = arith.addf %73, %75 : vector<8x128xf32>
    %77 = vector.broadcast %70 : f32 to vector<8x128xf32>
    %78 = arith.addf %76, %77 : vector<8x128xf32>
    %79 = math.tanh %78 : vector<8x128xf32>
    %80 = vector.broadcast %71 : f32 to vector<8x128xf32>
    %81 = arith.mulf %80, %79 : vector<8x128xf32>
    %82 = arith.addf %67, %81 : vector<8x128xf32>
    %c0_23 = arith.constant 0 : index
    %c1_24 = arith.constant 1 : index
    %83 = memref.load %arg1[%c0_23, %c1_24] : memref<5x32xf32, #tpu.memory_space<smem>>
    %c1_25 = arith.constant 1 : index
    %c1_26 = arith.constant 1 : index
    %84 = memref.load %arg1[%c1_25, %c1_26] : memref<5x32xf32, #tpu.memory_space<smem>>
    %c2_27 = arith.constant 2 : index
    %c1_28 = arith.constant 1 : index
    %85 = memref.load %arg1[%c2_27, %c1_28] : memref<5x32xf32, #tpu.memory_space<smem>>
    %c3_29 = arith.constant 3 : index
    %c1_30 = arith.constant 1 : index
    %86 = memref.load %arg1[%c3_29, %c1_30] : memref<5x32xf32, #tpu.memory_space<smem>>
    %87 = vector.broadcast %83 : f32 to vector<8x128xf32>
    %88 = arith.mulf %87, %9 : vector<8x128xf32>
    %89 = vector.broadcast %84 : f32 to vector<8x128xf32>
    %90 = arith.mulf %89, %66 : vector<8x128xf32>
    %91 = arith.addf %88, %90 : vector<8x128xf32>
    %92 = vector.broadcast %85 : f32 to vector<8x128xf32>
    %93 = arith.addf %91, %92 : vector<8x128xf32>
    %94 = math.tanh %93 : vector<8x128xf32>
    %95 = vector.broadcast %86 : f32 to vector<8x128xf32>
    %96 = arith.mulf %95, %94 : vector<8x128xf32>
    %97 = arith.addf %82, %96 : vector<8x128xf32>
    %c0_31 = arith.constant 0 : index
    %c2_32 = arith.constant 2 : index
    %98 = memref.load %arg1[%c0_31, %c2_32] : memref<5x32xf32, #tpu.memory_space<smem>>
    %c1_33 = arith.constant 1 : index
    %c2_34 = arith.constant 2 : index
    %99 = memref.load %arg1[%c1_33, %c2_34] : memref<5x32xf32, #tpu.memory_space<smem>>
    %c2_35 = arith.constant 2 : index
    %c2_36 = arith.constant 2 : index
    %100 = memref.load %arg1[%c2_35, %c2_36] : memref<5x32xf32, #tpu.memory_space<smem>>
    %c3_37 = arith.constant 3 : index
    %c2_38 = arith.constant 2 : index
    %101 = memref.load %arg1[%c3_37, %c2_38] : memref<5x32xf32, #tpu.memory_space<smem>>
    %102 = vector.broadcast %98 : f32 to vector<8x128xf32>
    %103 = arith.mulf %102, %9 : vector<8x128xf32>
    %104 = vector.broadcast %99 : f32 to vector<8x128xf32>
    %105 = arith.mulf %104, %66 : vector<8x128xf32>
    %106 = arith.addf %103, %105 : vector<8x128xf32>
    %107 = vector.broadcast %100 : f32 to vector<8x128xf32>
    %108 = arith.addf %106, %107 : vector<8x128xf32>
    %109 = math.tanh %108 : vector<8x128xf32>
    %110 = vector.broadcast %101 : f32 to vector<8x128xf32>
    %111 = arith.mulf %110, %109 : vector<8x128xf32>
    %112 = arith.addf %97, %111 : vector<8x128xf32>
    %c0_39 = arith.constant 0 : index
    %c3_40 = arith.constant 3 : index
    %113 = memref.load %arg1[%c0_39, %c3_40] : memref<5x32xf32, #tpu.memory_space<smem>>
    %c1_41 = arith.constant 1 : index
    %c3_42 = arith.constant 3 : index
    %114 = memref.load %arg1[%c1_41, %c3_42] : memref<5x32xf32, #tpu.memory_space<smem>>
    %c2_43 = arith.constant 2 : index
    %c3_44 = arith.constant 3 : index
    %115 = memref.load %arg1[%c2_43, %c3_44] : memref<5x32xf32, #tpu.memory_space<smem>>
    %c3_45 = arith.constant 3 : index
    %c3_46 = arith.constant 3 : index
    %116 = memref.load %arg1[%c3_45, %c3_46] : memref<5x32xf32, #tpu.memory_space<smem>>
    %117 = vector.broadcast %113 : f32 to vector<8x128xf32>
    %118 = arith.mulf %117, %9 : vector<8x128xf32>
    %119 = vector.broadcast %114 : f32 to vector<8x128xf32>
    %120 = arith.mulf %119, %66 : vector<8x128xf32>
    %121 = arith.addf %118, %120 : vector<8x128xf32>
    %122 = vector.broadcast %115 : f32 to vector<8x128xf32>
    %123 = arith.addf %121, %122 : vector<8x128xf32>
    %124 = math.tanh %123 : vector<8x128xf32>
    %125 = vector.broadcast %116 : f32 to vector<8x128xf32>
    %126 = arith.mulf %125, %124 : vector<8x128xf32>
    %127 = arith.addf %112, %126 : vector<8x128xf32>
    %c0_47 = arith.constant 0 : index
    %c4 = arith.constant 4 : index
    %128 = memref.load %arg1[%c0_47, %c4] : memref<5x32xf32, #tpu.memory_space<smem>>
    %c1_48 = arith.constant 1 : index
    %c4_49 = arith.constant 4 : index
    %129 = memref.load %arg1[%c1_48, %c4_49] : memref<5x32xf32, #tpu.memory_space<smem>>
    %c2_50 = arith.constant 2 : index
    %c4_51 = arith.constant 4 : index
    %130 = memref.load %arg1[%c2_50, %c4_51] : memref<5x32xf32, #tpu.memory_space<smem>>
    %c3_52 = arith.constant 3 : index
    %c4_53 = arith.constant 4 : index
    %131 = memref.load %arg1[%c3_52, %c4_53] : memref<5x32xf32, #tpu.memory_space<smem>>
    %132 = vector.broadcast %128 : f32 to vector<8x128xf32>
    %133 = arith.mulf %132, %9 : vector<8x128xf32>
    %134 = vector.broadcast %129 : f32 to vector<8x128xf32>
    %135 = arith.mulf %134, %66 : vector<8x128xf32>
    %136 = arith.addf %133, %135 : vector<8x128xf32>
    %137 = vector.broadcast %130 : f32 to vector<8x128xf32>
    %138 = arith.addf %136, %137 : vector<8x128xf32>
    %139 = math.tanh %138 : vector<8x128xf32>
    %140 = vector.broadcast %131 : f32 to vector<8x128xf32>
    %141 = arith.mulf %140, %139 : vector<8x128xf32>
    %142 = arith.addf %127, %141 : vector<8x128xf32>
    %c0_54 = arith.constant 0 : index
    %c5 = arith.constant 5 : index
    %143 = memref.load %arg1[%c0_54, %c5] : memref<5x32xf32, #tpu.memory_space<smem>>
    %c1_55 = arith.constant 1 : index
    %c5_56 = arith.constant 5 : index
    %144 = memref.load %arg1[%c1_55, %c5_56] : memref<5x32xf32, #tpu.memory_space<smem>>
    %c2_57 = arith.constant 2 : index
    %c5_58 = arith.constant 5 : index
    %145 = memref.load %arg1[%c2_57, %c5_58] : memref<5x32xf32, #tpu.memory_space<smem>>
    %c3_59 = arith.constant 3 : index
    %c5_60 = arith.constant 5 : index
    %146 = memref.load %arg1[%c3_59, %c5_60] : memref<5x32xf32, #tpu.memory_space<smem>>
    %147 = vector.broadcast %143 : f32 to vector<8x128xf32>
    %148 = arith.mulf %147, %9 : vector<8x128xf32>
    %149 = vector.broadcast %144 : f32 to vector<8x128xf32>
    %150 = arith.mulf %149, %66 : vector<8x128xf32>
    %151 = arith.addf %148, %150 : vector<8x128xf32>
    %152 = vector.broadcast %145 : f32 to vector<8x128xf32>
    %153 = arith.addf %151, %152 : vector<8x128xf32>
    %154 = math.tanh %153 : vector<8x128xf32>
    %155 = vector.broadcast %146 : f32 to vector<8x128xf32>
    %156 = arith.mulf %155, %154 : vector<8x128xf32>
    %157 = arith.addf %142, %156 : vector<8x128xf32>
    %c0_61 = arith.constant 0 : index
    %c6 = arith.constant 6 : index
    %158 = memref.load %arg1[%c0_61, %c6] : memref<5x32xf32, #tpu.memory_space<smem>>
    %c1_62 = arith.constant 1 : index
    %c6_63 = arith.constant 6 : index
    %159 = memref.load %arg1[%c1_62, %c6_63] : memref<5x32xf32, #tpu.memory_space<smem>>
    %c2_64 = arith.constant 2 : index
    %c6_65 = arith.constant 6 : index
    %160 = memref.load %arg1[%c2_64, %c6_65] : memref<5x32xf32, #tpu.memory_space<smem>>
    %c3_66 = arith.constant 3 : index
    %c6_67 = arith.constant 6 : index
    %161 = memref.load %arg1[%c3_66, %c6_67] : memref<5x32xf32, #tpu.memory_space<smem>>
    %162 = vector.broadcast %158 : f32 to vector<8x128xf32>
    %163 = arith.mulf %162, %9 : vector<8x128xf32>
    %164 = vector.broadcast %159 : f32 to vector<8x128xf32>
    %165 = arith.mulf %164, %66 : vector<8x128xf32>
    %166 = arith.addf %163, %165 : vector<8x128xf32>
    %167 = vector.broadcast %160 : f32 to vector<8x128xf32>
    %168 = arith.addf %166, %167 : vector<8x128xf32>
    %169 = math.tanh %168 : vector<8x128xf32>
    %170 = vector.broadcast %161 : f32 to vector<8x128xf32>
    %171 = arith.mulf %170, %169 : vector<8x128xf32>
    %172 = arith.addf %157, %171 : vector<8x128xf32>
    %c0_68 = arith.constant 0 : index
    %c7 = arith.constant 7 : index
    %173 = memref.load %arg1[%c0_68, %c7] : memref<5x32xf32, #tpu.memory_space<smem>>
    %c1_69 = arith.constant 1 : index
    %c7_70 = arith.constant 7 : index
    %174 = memref.load %arg1[%c1_69, %c7_70] : memref<5x32xf32, #tpu.memory_space<smem>>
    %c2_71 = arith.constant 2 : index
    %c7_72 = arith.constant 7 : index
    %175 = memref.load %arg1[%c2_71, %c7_72] : memref<5x32xf32, #tpu.memory_space<smem>>
    %c3_73 = arith.constant 3 : index
    %c7_74 = arith.constant 7 : index
    %176 = memref.load %arg1[%c3_73, %c7_74] : memref<5x32xf32, #tpu.memory_space<smem>>
    %177 = vector.broadcast %173 : f32 to vector<8x128xf32>
    %178 = arith.mulf %177, %9 : vector<8x128xf32>
    %179 = vector.broadcast %174 : f32 to vector<8x128xf32>
    %180 = arith.mulf %179, %66 : vector<8x128xf32>
    %181 = arith.addf %178, %180 : vector<8x128xf32>
    %182 = vector.broadcast %175 : f32 to vector<8x128xf32>
    %183 = arith.addf %181, %182 : vector<8x128xf32>
    %184 = math.tanh %183 : vector<8x128xf32>
    %185 = vector.broadcast %176 : f32 to vector<8x128xf32>
    %186 = arith.mulf %185, %184 : vector<8x128xf32>
    %187 = arith.addf %172, %186 : vector<8x128xf32>
    %c0_75 = arith.constant 0 : index
    %c8 = arith.constant 8 : index
    %188 = memref.load %arg1[%c0_75, %c8] : memref<5x32xf32, #tpu.memory_space<smem>>
    %c1_76 = arith.constant 1 : index
    %c8_77 = arith.constant 8 : index
    %189 = memref.load %arg1[%c1_76, %c8_77] : memref<5x32xf32, #tpu.memory_space<smem>>
    %c2_78 = arith.constant 2 : index
    %c8_79 = arith.constant 8 : index
    %190 = memref.load %arg1[%c2_78, %c8_79] : memref<5x32xf32, #tpu.memory_space<smem>>
    %c3_80 = arith.constant 3 : index
    %c8_81 = arith.constant 8 : index
    %191 = memref.load %arg1[%c3_80, %c8_81] : memref<5x32xf32, #tpu.memory_space<smem>>
    %192 = vector.broadcast %188 : f32 to vector<8x128xf32>
    %193 = arith.mulf %192, %9 : vector<8x128xf32>
    %194 = vector.broadcast %189 : f32 to vector<8x128xf32>
    %195 = arith.mulf %194, %66 : vector<8x128xf32>
    %196 = arith.addf %193, %195 : vector<8x128xf32>
    %197 = vector.broadcast %190 : f32 to vector<8x128xf32>
    %198 = arith.addf %196, %197 : vector<8x128xf32>
    %199 = math.tanh %198 : vector<8x128xf32>
    %200 = vector.broadcast %191 : f32 to vector<8x128xf32>
    %201 = arith.mulf %200, %199 : vector<8x128xf32>
    %202 = arith.addf %187, %201 : vector<8x128xf32>
    %c0_82 = arith.constant 0 : index
    %c9 = arith.constant 9 : index
    %203 = memref.load %arg1[%c0_82, %c9] : memref<5x32xf32, #tpu.memory_space<smem>>
    %c1_83 = arith.constant 1 : index
    %c9_84 = arith.constant 9 : index
    %204 = memref.load %arg1[%c1_83, %c9_84] : memref<5x32xf32, #tpu.memory_space<smem>>
    %c2_85 = arith.constant 2 : index
    %c9_86 = arith.constant 9 : index
    %205 = memref.load %arg1[%c2_85, %c9_86] : memref<5x32xf32, #tpu.memory_space<smem>>
    %c3_87 = arith.constant 3 : index
    %c9_88 = arith.constant 9 : index
    %206 = memref.load %arg1[%c3_87, %c9_88] : memref<5x32xf32, #tpu.memory_space<smem>>
    %207 = vector.broadcast %203 : f32 to vector<8x128xf32>
    %208 = arith.mulf %207, %9 : vector<8x128xf32>
    %209 = vector.broadcast %204 : f32 to vector<8x128xf32>
    %210 = arith.mulf %209, %66 : vector<8x128xf32>
    %211 = arith.addf %208, %210 : vector<8x128xf32>
    %212 = vector.broadcast %205 : f32 to vector<8x128xf32>
    %213 = arith.addf %211, %212 : vector<8x128xf32>
    %214 = math.tanh %213 : vector<8x128xf32>
    %215 = vector.broadcast %206 : f32 to vector<8x128xf32>
    %216 = arith.mulf %215, %214 : vector<8x128xf32>
    %217 = arith.addf %202, %216 : vector<8x128xf32>
    %c0_89 = arith.constant 0 : index
    %c10 = arith.constant 10 : index
    %218 = memref.load %arg1[%c0_89, %c10] : memref<5x32xf32, #tpu.memory_space<smem>>
    %c1_90 = arith.constant 1 : index
    %c10_91 = arith.constant 10 : index
    %219 = memref.load %arg1[%c1_90, %c10_91] : memref<5x32xf32, #tpu.memory_space<smem>>
    %c2_92 = arith.constant 2 : index
    %c10_93 = arith.constant 10 : index
    %220 = memref.load %arg1[%c2_92, %c10_93] : memref<5x32xf32, #tpu.memory_space<smem>>
    %c3_94 = arith.constant 3 : index
    %c10_95 = arith.constant 10 : index
    %221 = memref.load %arg1[%c3_94, %c10_95] : memref<5x32xf32, #tpu.memory_space<smem>>
    %222 = vector.broadcast %218 : f32 to vector<8x128xf32>
    %223 = arith.mulf %222, %9 : vector<8x128xf32>
    %224 = vector.broadcast %219 : f32 to vector<8x128xf32>
    %225 = arith.mulf %224, %66 : vector<8x128xf32>
    %226 = arith.addf %223, %225 : vector<8x128xf32>
    %227 = vector.broadcast %220 : f32 to vector<8x128xf32>
    %228 = arith.addf %226, %227 : vector<8x128xf32>
    %229 = math.tanh %228 : vector<8x128xf32>
    %230 = vector.broadcast %221 : f32 to vector<8x128xf32>
    %231 = arith.mulf %230, %229 : vector<8x128xf32>
    %232 = arith.addf %217, %231 : vector<8x128xf32>
    %c0_96 = arith.constant 0 : index
    %c11 = arith.constant 11 : index
    %233 = memref.load %arg1[%c0_96, %c11] : memref<5x32xf32, #tpu.memory_space<smem>>
    %c1_97 = arith.constant 1 : index
    %c11_98 = arith.constant 11 : index
    %234 = memref.load %arg1[%c1_97, %c11_98] : memref<5x32xf32, #tpu.memory_space<smem>>
    %c2_99 = arith.constant 2 : index
    %c11_100 = arith.constant 11 : index
    %235 = memref.load %arg1[%c2_99, %c11_100] : memref<5x32xf32, #tpu.memory_space<smem>>
    %c3_101 = arith.constant 3 : index
    %c11_102 = arith.constant 11 : index
    %236 = memref.load %arg1[%c3_101, %c11_102] : memref<5x32xf32, #tpu.memory_space<smem>>
    %237 = vector.broadcast %233 : f32 to vector<8x128xf32>
    %238 = arith.mulf %237, %9 : vector<8x128xf32>
    %239 = vector.broadcast %234 : f32 to vector<8x128xf32>
    %240 = arith.mulf %239, %66 : vector<8x128xf32>
    %241 = arith.addf %238, %240 : vector<8x128xf32>
    %242 = vector.broadcast %235 : f32 to vector<8x128xf32>
    %243 = arith.addf %241, %242 : vector<8x128xf32>
    %244 = math.tanh %243 : vector<8x128xf32>
    %245 = vector.broadcast %236 : f32 to vector<8x128xf32>
    %246 = arith.mulf %245, %244 : vector<8x128xf32>
    %247 = arith.addf %232, %246 : vector<8x128xf32>
    %c0_103 = arith.constant 0 : index
    %c12 = arith.constant 12 : index
    %248 = memref.load %arg1[%c0_103, %c12] : memref<5x32xf32, #tpu.memory_space<smem>>
    %c1_104 = arith.constant 1 : index
    %c12_105 = arith.constant 12 : index
    %249 = memref.load %arg1[%c1_104, %c12_105] : memref<5x32xf32, #tpu.memory_space<smem>>
    %c2_106 = arith.constant 2 : index
    %c12_107 = arith.constant 12 : index
    %250 = memref.load %arg1[%c2_106, %c12_107] : memref<5x32xf32, #tpu.memory_space<smem>>
    %c3_108 = arith.constant 3 : index
    %c12_109 = arith.constant 12 : index
    %251 = memref.load %arg1[%c3_108, %c12_109] : memref<5x32xf32, #tpu.memory_space<smem>>
    %252 = vector.broadcast %248 : f32 to vector<8x128xf32>
    %253 = arith.mulf %252, %9 : vector<8x128xf32>
    %254 = vector.broadcast %249 : f32 to vector<8x128xf32>
    %255 = arith.mulf %254, %66 : vector<8x128xf32>
    %256 = arith.addf %253, %255 : vector<8x128xf32>
    %257 = vector.broadcast %250 : f32 to vector<8x128xf32>
    %258 = arith.addf %256, %257 : vector<8x128xf32>
    %259 = math.tanh %258 : vector<8x128xf32>
    %260 = vector.broadcast %251 : f32 to vector<8x128xf32>
    %261 = arith.mulf %260, %259 : vector<8x128xf32>
    %262 = arith.addf %247, %261 : vector<8x128xf32>
    %c0_110 = arith.constant 0 : index
    %c13 = arith.constant 13 : index
    %263 = memref.load %arg1[%c0_110, %c13] : memref<5x32xf32, #tpu.memory_space<smem>>
    %c1_111 = arith.constant 1 : index
    %c13_112 = arith.constant 13 : index
    %264 = memref.load %arg1[%c1_111, %c13_112] : memref<5x32xf32, #tpu.memory_space<smem>>
    %c2_113 = arith.constant 2 : index
    %c13_114 = arith.constant 13 : index
    %265 = memref.load %arg1[%c2_113, %c13_114] : memref<5x32xf32, #tpu.memory_space<smem>>
    %c3_115 = arith.constant 3 : index
    %c13_116 = arith.constant 13 : index
    %266 = memref.load %arg1[%c3_115, %c13_116] : memref<5x32xf32, #tpu.memory_space<smem>>
    %267 = vector.broadcast %263 : f32 to vector<8x128xf32>
    %268 = arith.mulf %267, %9 : vector<8x128xf32>
    %269 = vector.broadcast %264 : f32 to vector<8x128xf32>
    %270 = arith.mulf %269, %66 : vector<8x128xf32>
    %271 = arith.addf %268, %270 : vector<8x128xf32>
    %272 = vector.broadcast %265 : f32 to vector<8x128xf32>
    %273 = arith.addf %271, %272 : vector<8x128xf32>
    %274 = math.tanh %273 : vector<8x128xf32>
    %275 = vector.broadcast %266 : f32 to vector<8x128xf32>
    %276 = arith.mulf %275, %274 : vector<8x128xf32>
    %277 = arith.addf %262, %276 : vector<8x128xf32>
    %c0_117 = arith.constant 0 : index
    %c14 = arith.constant 14 : index
    %278 = memref.load %arg1[%c0_117, %c14] : memref<5x32xf32, #tpu.memory_space<smem>>
    %c1_118 = arith.constant 1 : index
    %c14_119 = arith.constant 14 : index
    %279 = memref.load %arg1[%c1_118, %c14_119] : memref<5x32xf32, #tpu.memory_space<smem>>
    %c2_120 = arith.constant 2 : index
    %c14_121 = arith.constant 14 : index
    %280 = memref.load %arg1[%c2_120, %c14_121] : memref<5x32xf32, #tpu.memory_space<smem>>
    %c3_122 = arith.constant 3 : index
    %c14_123 = arith.constant 14 : index
    %281 = memref.load %arg1[%c3_122, %c14_123] : memref<5x32xf32, #tpu.memory_space<smem>>
    %282 = vector.broadcast %278 : f32 to vector<8x128xf32>
    %283 = arith.mulf %282, %9 : vector<8x128xf32>
    %284 = vector.broadcast %279 : f32 to vector<8x128xf32>
    %285 = arith.mulf %284, %66 : vector<8x128xf32>
    %286 = arith.addf %283, %285 : vector<8x128xf32>
    %287 = vector.broadcast %280 : f32 to vector<8x128xf32>
    %288 = arith.addf %286, %287 : vector<8x128xf32>
    %289 = math.tanh %288 : vector<8x128xf32>
    %290 = vector.broadcast %281 : f32 to vector<8x128xf32>
    %291 = arith.mulf %290, %289 : vector<8x128xf32>
    %292 = arith.addf %277, %291 : vector<8x128xf32>
    %c0_124 = arith.constant 0 : index
    %c15 = arith.constant 15 : index
    %293 = memref.load %arg1[%c0_124, %c15] : memref<5x32xf32, #tpu.memory_space<smem>>
    %c1_125 = arith.constant 1 : index
    %c15_126 = arith.constant 15 : index
    %294 = memref.load %arg1[%c1_125, %c15_126] : memref<5x32xf32, #tpu.memory_space<smem>>
    %c2_127 = arith.constant 2 : index
    %c15_128 = arith.constant 15 : index
    %295 = memref.load %arg1[%c2_127, %c15_128] : memref<5x32xf32, #tpu.memory_space<smem>>
    %c3_129 = arith.constant 3 : index
    %c15_130 = arith.constant 15 : index
    %296 = memref.load %arg1[%c3_129, %c15_130] : memref<5x32xf32, #tpu.memory_space<smem>>
    %297 = vector.broadcast %293 : f32 to vector<8x128xf32>
    %298 = arith.mulf %297, %9 : vector<8x128xf32>
    %299 = vector.broadcast %294 : f32 to vector<8x128xf32>
    %300 = arith.mulf %299, %66 : vector<8x128xf32>
    %301 = arith.addf %298, %300 : vector<8x128xf32>
    %302 = vector.broadcast %295 : f32 to vector<8x128xf32>
    %303 = arith.addf %301, %302 : vector<8x128xf32>
    %304 = math.tanh %303 : vector<8x128xf32>
    %305 = vector.broadcast %296 : f32 to vector<8x128xf32>
    %306 = arith.mulf %305, %304 : vector<8x128xf32>
    %307 = arith.addf %292, %306 : vector<8x128xf32>
    %c0_131 = arith.constant 0 : index
    %c16 = arith.constant 16 : index
    %308 = memref.load %arg1[%c0_131, %c16] : memref<5x32xf32, #tpu.memory_space<smem>>
    %c1_132 = arith.constant 1 : index
    %c16_133 = arith.constant 16 : index
    %309 = memref.load %arg1[%c1_132, %c16_133] : memref<5x32xf32, #tpu.memory_space<smem>>
    %c2_134 = arith.constant 2 : index
    %c16_135 = arith.constant 16 : index
    %310 = memref.load %arg1[%c2_134, %c16_135] : memref<5x32xf32, #tpu.memory_space<smem>>
    %c3_136 = arith.constant 3 : index
    %c16_137 = arith.constant 16 : index
    %311 = memref.load %arg1[%c3_136, %c16_137] : memref<5x32xf32, #tpu.memory_space<smem>>
    %312 = vector.broadcast %308 : f32 to vector<8x128xf32>
    %313 = arith.mulf %312, %9 : vector<8x128xf32>
    %314 = vector.broadcast %309 : f32 to vector<8x128xf32>
    %315 = arith.mulf %314, %66 : vector<8x128xf32>
    %316 = arith.addf %313, %315 : vector<8x128xf32>
    %317 = vector.broadcast %310 : f32 to vector<8x128xf32>
    %318 = arith.addf %316, %317 : vector<8x128xf32>
    %319 = math.tanh %318 : vector<8x128xf32>
    %320 = vector.broadcast %311 : f32 to vector<8x128xf32>
    %321 = arith.mulf %320, %319 : vector<8x128xf32>
    %322 = arith.addf %307, %321 : vector<8x128xf32>
    %c0_138 = arith.constant 0 : index
    %c17 = arith.constant 17 : index
    %323 = memref.load %arg1[%c0_138, %c17] : memref<5x32xf32, #tpu.memory_space<smem>>
    %c1_139 = arith.constant 1 : index
    %c17_140 = arith.constant 17 : index
    %324 = memref.load %arg1[%c1_139, %c17_140] : memref<5x32xf32, #tpu.memory_space<smem>>
    %c2_141 = arith.constant 2 : index
    %c17_142 = arith.constant 17 : index
    %325 = memref.load %arg1[%c2_141, %c17_142] : memref<5x32xf32, #tpu.memory_space<smem>>
    %c3_143 = arith.constant 3 : index
    %c17_144 = arith.constant 17 : index
    %326 = memref.load %arg1[%c3_143, %c17_144] : memref<5x32xf32, #tpu.memory_space<smem>>
    %327 = vector.broadcast %323 : f32 to vector<8x128xf32>
    %328 = arith.mulf %327, %9 : vector<8x128xf32>
    %329 = vector.broadcast %324 : f32 to vector<8x128xf32>
    %330 = arith.mulf %329, %66 : vector<8x128xf32>
    %331 = arith.addf %328, %330 : vector<8x128xf32>
    %332 = vector.broadcast %325 : f32 to vector<8x128xf32>
    %333 = arith.addf %331, %332 : vector<8x128xf32>
    %334 = math.tanh %333 : vector<8x128xf32>
    %335 = vector.broadcast %326 : f32 to vector<8x128xf32>
    %336 = arith.mulf %335, %334 : vector<8x128xf32>
    %337 = arith.addf %322, %336 : vector<8x128xf32>
    %c0_145 = arith.constant 0 : index
    %c18 = arith.constant 18 : index
    %338 = memref.load %arg1[%c0_145, %c18] : memref<5x32xf32, #tpu.memory_space<smem>>
    %c1_146 = arith.constant 1 : index
    %c18_147 = arith.constant 18 : index
    %339 = memref.load %arg1[%c1_146, %c18_147] : memref<5x32xf32, #tpu.memory_space<smem>>
    %c2_148 = arith.constant 2 : index
    %c18_149 = arith.constant 18 : index
    %340 = memref.load %arg1[%c2_148, %c18_149] : memref<5x32xf32, #tpu.memory_space<smem>>
    %c3_150 = arith.constant 3 : index
    %c18_151 = arith.constant 18 : index
    %341 = memref.load %arg1[%c3_150, %c18_151] : memref<5x32xf32, #tpu.memory_space<smem>>
    %342 = vector.broadcast %338 : f32 to vector<8x128xf32>
    %343 = arith.mulf %342, %9 : vector<8x128xf32>
    %344 = vector.broadcast %339 : f32 to vector<8x128xf32>
    %345 = arith.mulf %344, %66 : vector<8x128xf32>
    %346 = arith.addf %343, %345 : vector<8x128xf32>
    %347 = vector.broadcast %340 : f32 to vector<8x128xf32>
    %348 = arith.addf %346, %347 : vector<8x128xf32>
    %349 = math.tanh %348 : vector<8x128xf32>
    %350 = vector.broadcast %341 : f32 to vector<8x128xf32>
    %351 = arith.mulf %350, %349 : vector<8x128xf32>
    %352 = arith.addf %337, %351 : vector<8x128xf32>
    %c0_152 = arith.constant 0 : index
    %c19 = arith.constant 19 : index
    %353 = memref.load %arg1[%c0_152, %c19] : memref<5x32xf32, #tpu.memory_space<smem>>
    %c1_153 = arith.constant 1 : index
    %c19_154 = arith.constant 19 : index
    %354 = memref.load %arg1[%c1_153, %c19_154] : memref<5x32xf32, #tpu.memory_space<smem>>
    %c2_155 = arith.constant 2 : index
    %c19_156 = arith.constant 19 : index
    %355 = memref.load %arg1[%c2_155, %c19_156] : memref<5x32xf32, #tpu.memory_space<smem>>
    %c3_157 = arith.constant 3 : index
    %c19_158 = arith.constant 19 : index
    %356 = memref.load %arg1[%c3_157, %c19_158] : memref<5x32xf32, #tpu.memory_space<smem>>
    %357 = vector.broadcast %353 : f32 to vector<8x128xf32>
    %358 = arith.mulf %357, %9 : vector<8x128xf32>
    %359 = vector.broadcast %354 : f32 to vector<8x128xf32>
    %360 = arith.mulf %359, %66 : vector<8x128xf32>
    %361 = arith.addf %358, %360 : vector<8x128xf32>
    %362 = vector.broadcast %355 : f32 to vector<8x128xf32>
    %363 = arith.addf %361, %362 : vector<8x128xf32>
    %364 = math.tanh %363 : vector<8x128xf32>
    %365 = vector.broadcast %356 : f32 to vector<8x128xf32>
    %366 = arith.mulf %365, %364 : vector<8x128xf32>
    %367 = arith.addf %352, %366 : vector<8x128xf32>
    %c0_159 = arith.constant 0 : index
    %c20 = arith.constant 20 : index
    %368 = memref.load %arg1[%c0_159, %c20] : memref<5x32xf32, #tpu.memory_space<smem>>
    %c1_160 = arith.constant 1 : index
    %c20_161 = arith.constant 20 : index
    %369 = memref.load %arg1[%c1_160, %c20_161] : memref<5x32xf32, #tpu.memory_space<smem>>
    %c2_162 = arith.constant 2 : index
    %c20_163 = arith.constant 20 : index
    %370 = memref.load %arg1[%c2_162, %c20_163] : memref<5x32xf32, #tpu.memory_space<smem>>
    %c3_164 = arith.constant 3 : index
    %c20_165 = arith.constant 20 : index
    %371 = memref.load %arg1[%c3_164, %c20_165] : memref<5x32xf32, #tpu.memory_space<smem>>
    %372 = vector.broadcast %368 : f32 to vector<8x128xf32>
    %373 = arith.mulf %372, %9 : vector<8x128xf32>
    %374 = vector.broadcast %369 : f32 to vector<8x128xf32>
    %375 = arith.mulf %374, %66 : vector<8x128xf32>
    %376 = arith.addf %373, %375 : vector<8x128xf32>
    %377 = vector.broadcast %370 : f32 to vector<8x128xf32>
    %378 = arith.addf %376, %377 : vector<8x128xf32>
    %379 = math.tanh %378 : vector<8x128xf32>
    %380 = vector.broadcast %371 : f32 to vector<8x128xf32>
    %381 = arith.mulf %380, %379 : vector<8x128xf32>
    %382 = arith.addf %367, %381 : vector<8x128xf32>
    %c0_166 = arith.constant 0 : index
    %c21 = arith.constant 21 : index
    %383 = memref.load %arg1[%c0_166, %c21] : memref<5x32xf32, #tpu.memory_space<smem>>
    %c1_167 = arith.constant 1 : index
    %c21_168 = arith.constant 21 : index
    %384 = memref.load %arg1[%c1_167, %c21_168] : memref<5x32xf32, #tpu.memory_space<smem>>
    %c2_169 = arith.constant 2 : index
    %c21_170 = arith.constant 21 : index
    %385 = memref.load %arg1[%c2_169, %c21_170] : memref<5x32xf32, #tpu.memory_space<smem>>
    %c3_171 = arith.constant 3 : index
    %c21_172 = arith.constant 21 : index
    %386 = memref.load %arg1[%c3_171, %c21_172] : memref<5x32xf32, #tpu.memory_space<smem>>
    %387 = vector.broadcast %383 : f32 to vector<8x128xf32>
    %388 = arith.mulf %387, %9 : vector<8x128xf32>
    %389 = vector.broadcast %384 : f32 to vector<8x128xf32>
    %390 = arith.mulf %389, %66 : vector<8x128xf32>
    %391 = arith.addf %388, %390 : vector<8x128xf32>
    %392 = vector.broadcast %385 : f32 to vector<8x128xf32>
    %393 = arith.addf %391, %392 : vector<8x128xf32>
    %394 = math.tanh %393 : vector<8x128xf32>
    %395 = vector.broadcast %386 : f32 to vector<8x128xf32>
    %396 = arith.mulf %395, %394 : vector<8x128xf32>
    %397 = arith.addf %382, %396 : vector<8x128xf32>
    %c0_173 = arith.constant 0 : index
    %c22 = arith.constant 22 : index
    %398 = memref.load %arg1[%c0_173, %c22] : memref<5x32xf32, #tpu.memory_space<smem>>
    %c1_174 = arith.constant 1 : index
    %c22_175 = arith.constant 22 : index
    %399 = memref.load %arg1[%c1_174, %c22_175] : memref<5x32xf32, #tpu.memory_space<smem>>
    %c2_176 = arith.constant 2 : index
    %c22_177 = arith.constant 22 : index
    %400 = memref.load %arg1[%c2_176, %c22_177] : memref<5x32xf32, #tpu.memory_space<smem>>
    %c3_178 = arith.constant 3 : index
    %c22_179 = arith.constant 22 : index
    %401 = memref.load %arg1[%c3_178, %c22_179] : memref<5x32xf32, #tpu.memory_space<smem>>
    %402 = vector.broadcast %398 : f32 to vector<8x128xf32>
    %403 = arith.mulf %402, %9 : vector<8x128xf32>
    %404 = vector.broadcast %399 : f32 to vector<8x128xf32>
    %405 = arith.mulf %404, %66 : vector<8x128xf32>
    %406 = arith.addf %403, %405 : vector<8x128xf32>
    %407 = vector.broadcast %400 : f32 to vector<8x128xf32>
    %408 = arith.addf %406, %407 : vector<8x128xf32>
    %409 = math.tanh %408 : vector<8x128xf32>
    %410 = vector.broadcast %401 : f32 to vector<8x128xf32>
    %411 = arith.mulf %410, %409 : vector<8x128xf32>
    %412 = arith.addf %397, %411 : vector<8x128xf32>
    %c0_180 = arith.constant 0 : index
    %c23 = arith.constant 23 : index
    %413 = memref.load %arg1[%c0_180, %c23] : memref<5x32xf32, #tpu.memory_space<smem>>
    %c1_181 = arith.constant 1 : index
    %c23_182 = arith.constant 23 : index
    %414 = memref.load %arg1[%c1_181, %c23_182] : memref<5x32xf32, #tpu.memory_space<smem>>
    %c2_183 = arith.constant 2 : index
    %c23_184 = arith.constant 23 : index
    %415 = memref.load %arg1[%c2_183, %c23_184] : memref<5x32xf32, #tpu.memory_space<smem>>
    %c3_185 = arith.constant 3 : index
    %c23_186 = arith.constant 23 : index
    %416 = memref.load %arg1[%c3_185, %c23_186] : memref<5x32xf32, #tpu.memory_space<smem>>
    %417 = vector.broadcast %413 : f32 to vector<8x128xf32>
    %418 = arith.mulf %417, %9 : vector<8x128xf32>
    %419 = vector.broadcast %414 : f32 to vector<8x128xf32>
    %420 = arith.mulf %419, %66 : vector<8x128xf32>
    %421 = arith.addf %418, %420 : vector<8x128xf32>
    %422 = vector.broadcast %415 : f32 to vector<8x128xf32>
    %423 = arith.addf %421, %422 : vector<8x128xf32>
    %424 = math.tanh %423 : vector<8x128xf32>
    %425 = vector.broadcast %416 : f32 to vector<8x128xf32>
    %426 = arith.mulf %425, %424 : vector<8x128xf32>
    %427 = arith.addf %412, %426 : vector<8x128xf32>
    %c0_187 = arith.constant 0 : index
    %c24 = arith.constant 24 : index
    %428 = memref.load %arg1[%c0_187, %c24] : memref<5x32xf32, #tpu.memory_space<smem>>
    %c1_188 = arith.constant 1 : index
    %c24_189 = arith.constant 24 : index
    %429 = memref.load %arg1[%c1_188, %c24_189] : memref<5x32xf32, #tpu.memory_space<smem>>
    %c2_190 = arith.constant 2 : index
    %c24_191 = arith.constant 24 : index
    %430 = memref.load %arg1[%c2_190, %c24_191] : memref<5x32xf32, #tpu.memory_space<smem>>
    %c3_192 = arith.constant 3 : index
    %c24_193 = arith.constant 24 : index
    %431 = memref.load %arg1[%c3_192, %c24_193] : memref<5x32xf32, #tpu.memory_space<smem>>
    %432 = vector.broadcast %428 : f32 to vector<8x128xf32>
    %433 = arith.mulf %432, %9 : vector<8x128xf32>
    %434 = vector.broadcast %429 : f32 to vector<8x128xf32>
    %435 = arith.mulf %434, %66 : vector<8x128xf32>
    %436 = arith.addf %433, %435 : vector<8x128xf32>
    %437 = vector.broadcast %430 : f32 to vector<8x128xf32>
    %438 = arith.addf %436, %437 : vector<8x128xf32>
    %439 = math.tanh %438 : vector<8x128xf32>
    %440 = vector.broadcast %431 : f32 to vector<8x128xf32>
    %441 = arith.mulf %440, %439 : vector<8x128xf32>
    %442 = arith.addf %427, %441 : vector<8x128xf32>
    %c0_194 = arith.constant 0 : index
    %c25 = arith.constant 25 : index
    %443 = memref.load %arg1[%c0_194, %c25] : memref<5x32xf32, #tpu.memory_space<smem>>
    %c1_195 = arith.constant 1 : index
    %c25_196 = arith.constant 25 : index
    %444 = memref.load %arg1[%c1_195, %c25_196] : memref<5x32xf32, #tpu.memory_space<smem>>
    %c2_197 = arith.constant 2 : index
    %c25_198 = arith.constant 25 : index
    %445 = memref.load %arg1[%c2_197, %c25_198] : memref<5x32xf32, #tpu.memory_space<smem>>
    %c3_199 = arith.constant 3 : index
    %c25_200 = arith.constant 25 : index
    %446 = memref.load %arg1[%c3_199, %c25_200] : memref<5x32xf32, #tpu.memory_space<smem>>
    %447 = vector.broadcast %443 : f32 to vector<8x128xf32>
    %448 = arith.mulf %447, %9 : vector<8x128xf32>
    %449 = vector.broadcast %444 : f32 to vector<8x128xf32>
    %450 = arith.mulf %449, %66 : vector<8x128xf32>
    %451 = arith.addf %448, %450 : vector<8x128xf32>
    %452 = vector.broadcast %445 : f32 to vector<8x128xf32>
    %453 = arith.addf %451, %452 : vector<8x128xf32>
    %454 = math.tanh %453 : vector<8x128xf32>
    %455 = vector.broadcast %446 : f32 to vector<8x128xf32>
    %456 = arith.mulf %455, %454 : vector<8x128xf32>
    %457 = arith.addf %442, %456 : vector<8x128xf32>
    %c0_201 = arith.constant 0 : index
    %c26 = arith.constant 26 : index
    %458 = memref.load %arg1[%c0_201, %c26] : memref<5x32xf32, #tpu.memory_space<smem>>
    %c1_202 = arith.constant 1 : index
    %c26_203 = arith.constant 26 : index
    %459 = memref.load %arg1[%c1_202, %c26_203] : memref<5x32xf32, #tpu.memory_space<smem>>
    %c2_204 = arith.constant 2 : index
    %c26_205 = arith.constant 26 : index
    %460 = memref.load %arg1[%c2_204, %c26_205] : memref<5x32xf32, #tpu.memory_space<smem>>
    %c3_206 = arith.constant 3 : index
    %c26_207 = arith.constant 26 : index
    %461 = memref.load %arg1[%c3_206, %c26_207] : memref<5x32xf32, #tpu.memory_space<smem>>
    %462 = vector.broadcast %458 : f32 to vector<8x128xf32>
    %463 = arith.mulf %462, %9 : vector<8x128xf32>
    %464 = vector.broadcast %459 : f32 to vector<8x128xf32>
    %465 = arith.mulf %464, %66 : vector<8x128xf32>
    %466 = arith.addf %463, %465 : vector<8x128xf32>
    %467 = vector.broadcast %460 : f32 to vector<8x128xf32>
    %468 = arith.addf %466, %467 : vector<8x128xf32>
    %469 = math.tanh %468 : vector<8x128xf32>
    %470 = vector.broadcast %461 : f32 to vector<8x128xf32>
    %471 = arith.mulf %470, %469 : vector<8x128xf32>
    %472 = arith.addf %457, %471 : vector<8x128xf32>
    %c0_208 = arith.constant 0 : index
    %c27 = arith.constant 27 : index
    %473 = memref.load %arg1[%c0_208, %c27] : memref<5x32xf32, #tpu.memory_space<smem>>
    %c1_209 = arith.constant 1 : index
    %c27_210 = arith.constant 27 : index
    %474 = memref.load %arg1[%c1_209, %c27_210] : memref<5x32xf32, #tpu.memory_space<smem>>
    %c2_211 = arith.constant 2 : index
    %c27_212 = arith.constant 27 : index
    %475 = memref.load %arg1[%c2_211, %c27_212] : memref<5x32xf32, #tpu.memory_space<smem>>
    %c3_213 = arith.constant 3 : index
    %c27_214 = arith.constant 27 : index
    %476 = memref.load %arg1[%c3_213, %c27_214] : memref<5x32xf32, #tpu.memory_space<smem>>
    %477 = vector.broadcast %473 : f32 to vector<8x128xf32>
    %478 = arith.mulf %477, %9 : vector<8x128xf32>
    %479 = vector.broadcast %474 : f32 to vector<8x128xf32>
    %480 = arith.mulf %479, %66 : vector<8x128xf32>
    %481 = arith.addf %478, %480 : vector<8x128xf32>
    %482 = vector.broadcast %475 : f32 to vector<8x128xf32>
    %483 = arith.addf %481, %482 : vector<8x128xf32>
    %484 = math.tanh %483 : vector<8x128xf32>
    %485 = vector.broadcast %476 : f32 to vector<8x128xf32>
    %486 = arith.mulf %485, %484 : vector<8x128xf32>
    %487 = arith.addf %472, %486 : vector<8x128xf32>
    %c0_215 = arith.constant 0 : index
    %c28 = arith.constant 28 : index
    %488 = memref.load %arg1[%c0_215, %c28] : memref<5x32xf32, #tpu.memory_space<smem>>
    %c1_216 = arith.constant 1 : index
    %c28_217 = arith.constant 28 : index
    %489 = memref.load %arg1[%c1_216, %c28_217] : memref<5x32xf32, #tpu.memory_space<smem>>
    %c2_218 = arith.constant 2 : index
    %c28_219 = arith.constant 28 : index
    %490 = memref.load %arg1[%c2_218, %c28_219] : memref<5x32xf32, #tpu.memory_space<smem>>
    %c3_220 = arith.constant 3 : index
    %c28_221 = arith.constant 28 : index
    %491 = memref.load %arg1[%c3_220, %c28_221] : memref<5x32xf32, #tpu.memory_space<smem>>
    %492 = vector.broadcast %488 : f32 to vector<8x128xf32>
    %493 = arith.mulf %492, %9 : vector<8x128xf32>
    %494 = vector.broadcast %489 : f32 to vector<8x128xf32>
    %495 = arith.mulf %494, %66 : vector<8x128xf32>
    %496 = arith.addf %493, %495 : vector<8x128xf32>
    %497 = vector.broadcast %490 : f32 to vector<8x128xf32>
    %498 = arith.addf %496, %497 : vector<8x128xf32>
    %499 = math.tanh %498 : vector<8x128xf32>
    %500 = vector.broadcast %491 : f32 to vector<8x128xf32>
    %501 = arith.mulf %500, %499 : vector<8x128xf32>
    %502 = arith.addf %487, %501 : vector<8x128xf32>
    %c0_222 = arith.constant 0 : index
    %c29 = arith.constant 29 : index
    %503 = memref.load %arg1[%c0_222, %c29] : memref<5x32xf32, #tpu.memory_space<smem>>
    %c1_223 = arith.constant 1 : index
    %c29_224 = arith.constant 29 : index
    %504 = memref.load %arg1[%c1_223, %c29_224] : memref<5x32xf32, #tpu.memory_space<smem>>
    %c2_225 = arith.constant 2 : index
    %c29_226 = arith.constant 29 : index
    %505 = memref.load %arg1[%c2_225, %c29_226] : memref<5x32xf32, #tpu.memory_space<smem>>
    %c3_227 = arith.constant 3 : index
    %c29_228 = arith.constant 29 : index
    %506 = memref.load %arg1[%c3_227, %c29_228] : memref<5x32xf32, #tpu.memory_space<smem>>
    %507 = vector.broadcast %503 : f32 to vector<8x128xf32>
    %508 = arith.mulf %507, %9 : vector<8x128xf32>
    %509 = vector.broadcast %504 : f32 to vector<8x128xf32>
    %510 = arith.mulf %509, %66 : vector<8x128xf32>
    %511 = arith.addf %508, %510 : vector<8x128xf32>
    %512 = vector.broadcast %505 : f32 to vector<8x128xf32>
    %513 = arith.addf %511, %512 : vector<8x128xf32>
    %514 = math.tanh %513 : vector<8x128xf32>
    %515 = vector.broadcast %506 : f32 to vector<8x128xf32>
    %516 = arith.mulf %515, %514 : vector<8x128xf32>
    %517 = arith.addf %502, %516 : vector<8x128xf32>
    %c0_229 = arith.constant 0 : index
    %c30 = arith.constant 30 : index
    %518 = memref.load %arg1[%c0_229, %c30] : memref<5x32xf32, #tpu.memory_space<smem>>
    %c1_230 = arith.constant 1 : index
    %c30_231 = arith.constant 30 : index
    %519 = memref.load %arg1[%c1_230, %c30_231] : memref<5x32xf32, #tpu.memory_space<smem>>
    %c2_232 = arith.constant 2 : index
    %c30_233 = arith.constant 30 : index
    %520 = memref.load %arg1[%c2_232, %c30_233] : memref<5x32xf32, #tpu.memory_space<smem>>
    %c3_234 = arith.constant 3 : index
    %c30_235 = arith.constant 30 : index
    %521 = memref.load %arg1[%c3_234, %c30_235] : memref<5x32xf32, #tpu.memory_space<smem>>
    %522 = vector.broadcast %518 : f32 to vector<8x128xf32>
    %523 = arith.mulf %522, %9 : vector<8x128xf32>
    %524 = vector.broadcast %519 : f32 to vector<8x128xf32>
    %525 = arith.mulf %524, %66 : vector<8x128xf32>
    %526 = arith.addf %523, %525 : vector<8x128xf32>
    %527 = vector.broadcast %520 : f32 to vector<8x128xf32>
    %528 = arith.addf %526, %527 : vector<8x128xf32>
    %529 = math.tanh %528 : vector<8x128xf32>
    %530 = vector.broadcast %521 : f32 to vector<8x128xf32>
    %531 = arith.mulf %530, %529 : vector<8x128xf32>
    %532 = arith.addf %517, %531 : vector<8x128xf32>
    %c0_236 = arith.constant 0 : index
    %c31 = arith.constant 31 : index
    %533 = memref.load %arg1[%c0_236, %c31] : memref<5x32xf32, #tpu.memory_space<smem>>
    %c1_237 = arith.constant 1 : index
    %c31_238 = arith.constant 31 : index
    %534 = memref.load %arg1[%c1_237, %c31_238] : memref<5x32xf32, #tpu.memory_space<smem>>
    %c2_239 = arith.constant 2 : index
    %c31_240 = arith.constant 31 : index
    %535 = memref.load %arg1[%c2_239, %c31_240] : memref<5x32xf32, #tpu.memory_space<smem>>
    %c3_241 = arith.constant 3 : index
    %c31_242 = arith.constant 31 : index
    %536 = memref.load %arg1[%c3_241, %c31_242] : memref<5x32xf32, #tpu.memory_space<smem>>
    %537 = vector.broadcast %533 : f32 to vector<8x128xf32>
    %538 = arith.mulf %537, %9 : vector<8x128xf32>
    %539 = vector.broadcast %534 : f32 to vector<8x128xf32>
    %540 = arith.mulf %539, %66 : vector<8x128xf32>
    %541 = arith.addf %538, %540 : vector<8x128xf32>
    %542 = vector.broadcast %535 : f32 to vector<8x128xf32>
    %543 = arith.addf %541, %542 : vector<8x128xf32>
    %544 = math.tanh %543 : vector<8x128xf32>
    %545 = vector.broadcast %536 : f32 to vector<8x128xf32>
    %546 = arith.mulf %545, %544 : vector<8x128xf32>
    %547 = arith.addf %532, %546 : vector<8x128xf32>
    %c4_243 = arith.constant 4 : index
    %c0_244 = arith.constant 0 : index
    %548 = memref.load %arg1[%c4_243, %c0_244] : memref<5x32xf32, #tpu.memory_space<smem>>
    %549 = vector.broadcast %548 : f32 to vector<8x128xf32>
    %550 = arith.addf %547, %549 : vector<8x128xf32>
    %551 = arith.negf %550 : vector<8x128xf32>
    %552 = math.exp %551 : vector<8x128xf32>
    %cst_245 = arith.constant 1.000000e+00 : f32
    %553 = vector.broadcast %cst_245 : f32 to vector<8x128xf32>
    %554 = arith.addf %553, %552 : vector<8x128xf32>
    %555 = arith.divf %553, %554 : vector<8x128xf32>
    %556 = arith.index_cast %1 : i32 to index
    %c0_246 = arith.constant 0 : index
    %557 = vector.load %arg4[%556, %c0_246] : memref<8x128xf32, #tpu.memory_space<vmem>>, vector<8x128xf32>
    tpu.vector_store %arg4[%556, %c0_246], %555 {strides = array<i32>} : memref<8x128xf32, #tpu.memory_space<vmem>>, vector<8x128xf32>,
    %c1_i32 = arith.constant 1 : i32
    return
  }
  func.func @transform_0(%arg0: i32) -> (i32, i32) {
    %c0_i32 = arith.constant 0 : i32
    %c0_i32_0 = arith.constant 0 : i32
    %c0_i32_1 = arith.constant 0 : i32
    return %c0_i32, %c0_i32_0 : i32, i32
  }
  func.func @transform_1(%arg0: i32) -> (i32, i32) {
    %c0_i32 = arith.constant 0 : i32
    %c0_i32_0 = arith.constant 0 : i32
    return %arg0, %c0_i32 : i32, i32
  }
  func.func @transform_2(%arg0: i32) -> (i32, i32) {
    %c0_i32 = arith.constant 0 : i32
    %c0_i32_0 = arith.constant 0 : i32
    return %arg0, %c0_i32 : i32, i32
  }
  func.func @transform_3(%arg0: i32) -> (i32, i32) {
    %c0_i32 = arith.constant 0 : i32
    %c0_i32_0 = arith.constant 0 : i32
    return %arg0, %c0_i32 : i32, i32
  }
}

</mosaic_0001>

<bundles_post_ra>
// kernel: polarnet_forward.1
= control target key start
LH: loop header
LB: loop body
LE: loop exit
PB: predicated region body
PF: predicated region fallthrough
CT: control target
= control target key end

     0   :  { %s1479_s0 = inlined_call_operand.vmem [shape: f32[5,32], index: 0, kind: input, shape index: {}]   ;;  %s1480_s1 = inlined_call_operand.vmem [shape: f32[8,128], index: 1, kind: input, shape index: {}]   ;;  %s1481_s2 = inlined_call_operand.vmem [shape: f32[8,128], index: 2, kind: input, shape index: {}]   ;;  %s1482_s3 = inlined_call_operand.vmem [shape: f32[8,128], index: 3, kind: output, shape index: {}]  }
   0x1   :  { %1522 = sst [smem:[#allocation41_spill]] %s1482_s3 }
   0x2   :  { %8 = vsyncpa [#allocation3], 0  ;;  %s15_s14 = sshll.u32 %s1479_s0, 4  ;;  %s16_s14 = int_to_ptr.vmem [resolvable:$true] %s15_s14 }
   0x3   :  { %s782_s15 = scalar_lea.vmem %s16_s14, 128  ;;  %p787_p1 = scmp.lt.s32.totalorder %s16_s14, %s16_s14 }
   0x4   :  { %p783_p0 = scmp.ne.s32.totalorder %s16_s14, %s782_s15  ;;  %p788_p2 = scmp.lt.s32.totalorder %s782_s15, %s782_s15 }
   0x6   :  { %p789_p3 = por %p788_p2, %p787_p1 }
   0x8   :  { %p790_p4 = pnand %p789_p3, %p783_p0 }
   0xa   :  { %793 = shalt.err (!%p790_p4)
}
   0xb   :  { %s796_s16 = smov [#allocation2]  }
   0xc   :  { %18 = dma.vmem_to_smem %s16_s14, 128, %s796_s16, [#allocation3]  }
   0xd   :  { %794 = dma.done.wait [#allocation3], 128  }
   0xe   :  { %795 = vsyncadd [#allocation3], 4294967168 }
   0xf   :  { %26 = sfence }
  0x10   :  { %v824_v0 = vld [vmem:[%s1480_s1] sm:$0xff]  ;;  %s841_s1 = sld [smem:[#allocation2]] }
  0x11   :  { %v829_v1 = vld [vmem:[%s1481_s2] sm:$0xff]  ;;  %v832_v2 = vand.u32 2147483647, %v824_v0  ;;  %s843_s20 = sld [smem:[#allocation2 + $0x80]]  ;;  %v29_v13 = vmul.f32 %v824_v0, %v824_v0  ;;  %vm73_vm4 = vcmp.lt.f32.partialorder %v824_v0, 0.0 }
  0x12   :  { %v835_v3 = vand.u32 2147483647, %v829_v1  ;;  %s845_s2 = sld [smem:[#allocation2 + $0x100]]  ;;  %v30_v14 = vmul.f32 %v829_v1, %v829_v1  ;;  %vm76_vm5 = vcmp.lt.f32.partialorder %v829_v1, 0.0 }
  0x13   :  { %s847_s21 = sld [smem:[#allocation2 + $0x180]] }
  0x14   :  { %v41_v4 = vmax.f32 %v832_v2, %v835_v3  ;;  %vm70_vm0 = vcmp.gt.f32.partialorder %v835_v3, %v832_v2  ;;  %s849_s22 = sld [smem:[#allocation2 + $0x1]]  ;;  %v42_v8 = vmin.f32 %v832_v2, %v835_v3  ;;  %v31_v15 = vadd.f32 %v30_v14, %v29_v13 }
  0x15   :  { %s851_s23 = sld [smem:[#allocation2 + $0x81]] }
  0x16   :  { %v43_v5 = vmax.f32 %v41_v4, 1.1754944e-38  ;;  %s853_s24 = sld [smem:[#allocation2 + $0x101]]  ;;  %vm34_vm2 = vcmp.eq.f32.partialorder %v31_v15, inf  ;;  %v37_v27 = vand.u32 2147483648, %v31_v15  ;;  %vm36_vm3 = vcmp.eq.f32.partialorder %v31_v15, 0.0 }
  0x17   :  { %s855_s25 = sld [smem:[#allocation2 + $0x181]]  ;;  %v83_v31 = vstv %s841_s1  ;;  %v85_v32 = vstv %s843_s20 }
  0x18   :  { %708 = vrcp.f32 %v43_v5  ;;  %1523 = sst [smem:[#allocation5_spill]] %s845_s2  ;;  %v88_v33 = vstv %s845_s2 }
  0x19   :  { %1524 = sst [smem:[#allocation6_spill]] %s847_s21  ;;  %v91_v34 = vstv %s847_s21 }
  0x1a   :  { %s857_s26 = sld [smem:[#allocation2 + $0x2]]  ;;  %v98_v35 = vstv %s849_s22 }
  0x1b   :  { %1525 = sst [smem:[#allocation7_spill]] %s851_s23  ;;  %v100_v38 = vstv %s851_s23 }
  0x1c   :  { %1526 = sst [smem:[#allocation8_spill]] %s853_s24  ;;  %v103_v39 = vstv %s853_s24 }
  0x1d   :  { %1527 = sst [smem:[#allocation9_spill]] %s855_s25  ;;  %v106_v40 = vstv %s855_s25 }
  0x1e   :  { %s859_s27 = sld [smem:[#allocation2 + $0x82]] }
  0x1f   :  { %s861_s28 = sld [smem:[#allocation2 + $0x102]] }
  0x20   :  { %s865_s29 = sld [smem:[#allocation2 + $0x182]]  ;;  %v113_v41 = vstv %s857_s26 }
  0x21   :  { %s867_s30 = sld [smem:[#allocation2 + $0x3]] }
  0x22   :  { %s869_s4 = sld [smem:[#allocation2 + $0x83]] }
  0x23   :  { %s871_s5 = sld [smem:[#allocation2 + $0x103]] }
  0x24   :  { %1528 = sst [smem:[#allocation10_spill]] %s859_s27  ;;  %v115_v42 = vstv %s859_s27 }
  0x25   :  { %v709_v6 = vpop.eup %708  ;;  %1529 = sst [smem:[#allocation11_spill]] %s861_s28  ;;  %v118_v43 = vstv %s861_s28 }
  0x26   :  { %v45_v7 = vmul.f32 %v709_v6, %v43_v5  ;;  %1530 = sst [smem:[#allocation12_spill]] %s865_s29  ;;  %v121_v45 = vstv %s865_s29 }
  0x27   :  { %s875_s6 = sld [smem:[#allocation2 + $0x183]]  ;;  %v128_v46 = vstv %s867_s30 }
  0x28   :  { %v46_v9 = vsub.f32 2.0, %v45_v7  ;;  %1531 = sst [smem:[#allocation13_spill]] %s869_s4  ;;  %v130_v49 = vstv %s869_s4 }
  0x29   :  { %1532 = sst [smem:[#allocation14_spill]] %s871_s5  ;;  %v133_v50 = vstv %s871_s5 }
  0x2a   :  { %v47_v10 = vmul.f32 %v709_v6, %v46_v9  ;;  %s877_s7 = sld [smem:[#allocation2 + $0x4]]  ;;  %v797_v9 = vmov 0.0  }
  0x2b   :  { %s880_s8 = sld [smem:[#allocation2 + $0x84]] }
  0x2c   :  { %v873_v11 = vmul.f32 %v47_v10, %v42_v8  ;;  %s882_s9 = sld [smem:[#allocation2 + $0x104]] }
  0x2d   :  { %1533 = sst [smem:[#allocation15_spill]] %s875_s6  ;;  %v136_v51 = vstv %s875_s6 }
  0x2e   :  { %v51_v12 = vadd.f32 1.0, %v873_v11  ;;  %s888_s10 = sld [smem:[#allocation2 + $0x184]]  ;;  %v574_v18 = vadd.f32 -1.0, %v873_v11  ;;  %vm49_vm1 = vcmp.gt.f32.partialorder %v873_v11, 0.41421357 }
  0x2f   :  { %s890_s11 = sld [smem:[#allocation2 + $0x5]]  ;;  %v68_v10 = vsel %vm49_vm1, 0.7853982, %v797_v9 }
  0x30   :  { %710 = vrcp.f32 %v51_v12  ;;  %s892_s12 = sld [smem:[#allocation2 + $0x85]]  ;;  %v143_v47 = vstv %s877_s7 }
  0x31   :  { %1534 = sst [smem:[#allocation16_spill]] %s880_s8  ;;  %712 = vrsqrt.f32 %v31_v15  ;;  %v145_v58 = vstv %s880_s8 }
  0x32   :  { %1535 = sst [smem:[#allocation17_spill]] %s882_s9  ;;  %v148_v61 = vstv %s882_s9 }
  0x33   :  { %s894_s13 = sld [smem:[#allocation2 + $0x105]] }
  0x34   :  { %1536 = sst [smem:[#allocation18_spill]] %s888_s10  ;;  %v151_v62 = vstv %s888_s10 }
  0x35   :  { %s896_s14 = sld [smem:[#allocation2 + $0x185]]  ;;  %v158_v55 = vstv %s890_s11 }
  0x36   :  { %1537 = sst [smem:[#allocation19_spill]] %s892_s12 }
  0x37   :  { %s898_s15 = sld [smem:[#allocation2 + $0x6]] }
  0x38   :  { %s900_s16 = sld [smem:[#allocation2 + $0x86]] }
  0x39   :  { %1538 = sst [smem:[#allocation20_spill]] %s894_s13 }
  0x3a   :  { %s902_s17 = sld [smem:[#allocation2 + $0x106]] }
  0x3b   :  { %1539 = sst [smem:[#allocation21_spill]] %s896_s14 }
  0x3c   :  { %s904_s18 = sld [smem:[#allocation2 + $0x186]] }
  0x3d   :  { %s906_s19 = sld [smem:[#allocation2 + $0x7]]  ;;  %v711_v16 = vpop.eup %710  ;;  %v173_v59 = vstv %s898_s15 }
  0x3e   :  { %1540 = sst [smem:[#allocation22_spill]] %s900_s16  ;;  %v53_v17 = vmul.f32 %v711_v16, %v51_v12  ;;  %v713_v22 = vpop.eup %712 }
  0x3f   :  { %s908_s0 = sld [smem:[#allocation2 + $0x87]]  ;;  %v33_v25 = vmul.f32 %v713_v22, %v31_v15 }
  0x40   :  { %1541 = sst [smem:[#allocation23_spill]] %s902_s17  ;;  %v54_v19 = vsub.f32 2.0, %v53_v17 }
  0x41   :  { %s910_s3 = sld [smem:[#allocation2 + $0x107]]  ;;  %v35_v29 = vsel %vm34_vm2, %v31_v15, %v33_v25 }
  0x42   :  { %1542 = sst [smem:[#allocation24_spill]] %s904_s18  ;;  %v55_v20 = vmul.f32 %v711_v16, %v54_v19  ;;  %v964_v36 = vsel %vm36_vm3, %v37_v27, %v35_v29 }
  0x43   :  { %s912_s12 = sld [smem:[#allocation2 + $0x187]]  ;;  %v982_v48 = vmul.f32 %v83_v31, %v964_v36  ;;  %v990_v53 = vmul.f32 %v98_v35, %v964_v36  ;;  %v993_v54 = vmul.f32 %v113_v41, %v964_v36  ;;  %v999_v56 = vmul.f32 %v128_v46, %v964_v36 }
  0x44   :  { %s914_s13 = sld [smem:[#allocation2 + $0x8]]  ;;  %v56_v21 = vmul.f32 %v574_v18, %v55_v20  ;;  %v1002_v57 = vmul.f32 %v143_v47, %v964_v36  ;;  %v188_v63 = vstv %s906_s19  ;;  %v1014_v4 = vmul.f32 %v158_v55, %v964_v36 }
  0x45   :  { %1543 = sst [smem:[#allocation25_spill]] %s908_s0  ;;  %v1026_v12 = vmul.f32 %v173_v59, %v964_v36  ;;  %v1035_v17 = vmul.f32 %v188_v63, %v964_v36 }
  0x46   :  { %s916_s14 = sld [smem:[#allocation2 + $0x88]]  ;;  %v937_v23 = vsel %vm49_vm1, %v56_v21, %v873_v11 }
  0x47   :  { %1544 = sst [smem:[#allocation26_spill]] %s910_s3  ;;  %v58_v24 = vmul.f32 %v937_v23, %v937_v23 }
  0x48   :  { %s918_s16 = sld [smem:[#allocation2 + $0x108]] }
  0x49   :  { %1545 = sst [smem:[#allocation27_spill]] %s912_s12  ;;  %v59_v26 = vmul.f32 0.080537446, %v58_v24 }
  0x4a   :  { %s921_s18 = sld [smem:[#allocation2 + $0x188]]  ;;  %v203_v13 = vstv %s914_s13 }
  0x4b   :  { %s923_s17 = sld [smem:[#allocation2 + $0x9]]  ;;  %v575_v28 = vadd.f32 -0.13877685, %v59_v26  ;;  %v1048_v22 = vmul.f32 %v203_v13, %v964_v36 }
  0x4c   :  { %1546 = sst [smem:[#allocation28_spill]] %s916_s14 }
  0x4d   :  { %s925_s0 = sld [smem:[#allocation2 + $0x89]]  ;;  %v61_v30 = vmul.f32 %v575_v28, %v58_v24 }
  0x4e   :  { %1547 = sst [smem:[#allocation29_spill]] %s918_s16 }
  0x4f   :  { %s928_s12 = sld [smem:[#allocation2 + $0x109]]  ;;  %v62_v37 = vadd.f32 0.19977711, %v61_v30 }
  0x50   :  { %1548 = sst [smem:[#allocation30_spill]] %s921_s18 }
  0x51   :  { %s930_s3 = sld [smem:[#allocation2 + $0x189]]  ;;  %v63_v44 = vmul.f32 %v62_v37, %v58_v24  ;;  %v218_v20 = vstv %s923_s17 }
  0x52   :  { %s932_s14 = sld [smem:[#allocation2 + $0xa]]  ;;  %v1060_v29 = vmul.f32 %v218_v20, %v964_v36 }
  0x53   :  { %1549 = sst [smem:[#allocation31_spill]] %s925_s0  ;;  %v576_v52 = vadd.f32 -0.3333295, %v63_v44 }
  0x54   :  { %s939_s18 = sld [smem:[#allocation2 + $0x8a]] }
  0x55   :  { %1550 = sst [smem:[#allocation32_spill]] %s928_s12  ;;  %v65_v60 = vmul.f32 %v576_v52, %v58_v24 }
  0x56   :  { %s943_s0 = sld [smem:[#allocation2 + $0x10a]] }
  0x57   :  { %1551 = sst [smem:[#allocation33_spill]] %s930_s3  ;;  %v66_v8 = vmul.f32 %v65_v60, %v937_v23 }
  0x58   :  { %s945_s3 = sld [smem:[#allocation2 + $0x18a]]  ;;  %v233_v25 = vstv %s932_s14 }
  0x59   :  { %s947_s12 = sld [smem:[#allocation2 + $0xb]]  ;;  %v67_v11 = vadd.f32 %v66_v8, %v937_v23  ;;  %v1068_v41 = vmul.f32 %v233_v25, %v964_v36 }
  0x5a   :  { %1552 = sst [smem:[#allocation34_spill]] %s939_s18 }
  0x5b   :  { %s949_s16 = sld [smem:[#allocation2 + $0x8b]]  ;;  %v69_v23 = vadd.f32 %v68_v10, %v67_v11 }
  0x5c   :  { %1553 = sst [smem:[#allocation35_spill]] %s943_s0 }
  0x5d   :  { %s951_s18 = sld [smem:[#allocation2 + $0x10b]]  ;;  %v71_v37 = vsub.f32 1.5707964, %v69_v23 }
  0x5e   :  { %1554 = sst [smem:[#allocation36_spill]] %s945_s3 }
  0x5f   :  { %s953_s0 = sld [smem:[#allocation2 + $0x18b]]  ;;  %v248_v28 = vstv %s947_s12  ;;  %v72_v60 = vsel %vm70_vm0, %v71_v37, %v69_v23 }
  0x60   :  { %s956_s3 = sld [smem:[#allocation2 + $0xc]]  ;;  %v1077_v55 = vmul.f32 %v248_v28, %v964_v36  ;;  %v74_v10 = vsub.f32 3.1415927, %v72_v60 }
  0x61   :  { %s968_s1 = sld [smem:[#allocation2 + $0x10c]]  ;;  %v250_v63 = vstv %s949_s16 }
  0x62   :  { %s974_s21 = sld [smem:[#allocation2 + $0x18c]]  ;;  %v75_v28 = vsel %vm73_vm4, %v74_v10, %v72_v60 }
  0x63   :  { %1555 = sst [smem:[#allocation37_spill]] %s951_s18  ;;  %v77_v2 = vsub.f32 0.0, %v75_v28 }
  0x64   :  { %s962_s18 = sld [smem:[#allocation2 + $0x8c]] }
  0x65   :  { %1556 = sst [smem:[#allocation38_spill]] %s953_s0 }
  0x66   :  { %s979_s22 = sld [smem:[#allocation2 + $0xd]]  ;;  %v263_v46 = vstv %s956_s3 }
  0x67   :  { %s987_s26 = sld [smem:[#allocation2 + $0x8d]]  ;;  %v1089_v13 = vmul.f32 %v263_v46, %v964_v36  ;;  %v268_v25 = vstv %s968_s1 }
  0x68   :  { %1557 = sst [smem:[#allocation39_spill]] %s974_s21 }
  0x69   :  { %s1558_s29 = sld [smem:[#allocation19_spill]] }
  0x6a   :  { %s1559_s30 = sld [smem:[#allocation20_spill]]  ;;  %v265_v11 = vstv %s962_s18 }
  0x6b   :  { %s996_s25 = sld [smem:[#allocation2 + $0x10d]] }
  0x6c   :  { %s1006_s6 = sld [smem:[#allocation2 + $0x18d]]  ;;  %v278_v59 = vstv %s979_s22 }
  0x6d   :  { %s1562_s5 = sld [smem:[#allocation22_spill]]  ;;  %v1096_v3 = vmul.f32 %v278_v59, %v964_v36  ;;  %v280_v37 = vstv %s987_s26  ;;  %v1123_v59 = vsel %vm76_vm5, %v77_v2, %v75_v28 }
  0x6e   :  { %s1563_s28 = sld [smem:[#allocation23_spill]]  ;;  %v86_v7 = vmul.f32 %v85_v32, %v1123_v59  ;;  %v116_v60 = vmul.f32 %v115_v42, %v1123_v59  ;;  %v131_v1 = vmul.f32 %v130_v49, %v1123_v59 }
  0x6f   :  { %s1011_s24 = sld [smem:[#allocation2 + $0xe]]  ;;  %v160_v5 = vstv %s1558_s29 }
  0x70   :  { %v163_v6 = vstv %s1559_s30  ;;  %s1565_s2 = sld [smem:[#allocation25_spill]]  ;;  %v161_v32 = vmul.f32 %v160_v5, %v1123_v59  ;;  %v87_v49 = vadd.f32 %v86_v7, %v982_v48  ;;  %v132_v28 = vadd.f32 %v131_v1, %v999_v56 }
  0x71   :  { %s1566_s15 = sld [smem:[#allocation26_spill]]  ;;  %v283_v46 = vstv %s996_s25 }
  0x72   :  { %1561 = sst [smem:[#allocation40_spill]] %s1006_s6 }
  0x73   :  { %s1019_s8 = sld [smem:[#allocation2 + $0x8e]]  ;;  %v175_v14 = vstv %s1562_s5 }
  0x74   :  { %s1568_s10 = sld [smem:[#allocation28_spill]]  ;;  %v178_v15 = vstv %s1563_s28 }
  0x75   :  { %s1029_s7 = sld [smem:[#allocation2 + $0x10e]]  ;;  %v293_v20 = vstv %s1011_s24 }
  0x76   :  { %s1569_s30 = sld [smem:[#allocation29_spill]]  ;;  %v190_v18 = vstv %s1565_s2  ;;  %v1110_v52 = vmul.f32 %v293_v20, %v964_v36 }
  0x77   :  { %s1037_s29 = sld [smem:[#allocation2 + $0x18e]]  ;;  %v193_v19 = vstv %s1566_s15  ;;  %v191_v20 = vmul.f32 %v190_v18, %v1123_v59 }
  0x78   :  { %s1572_s4 = sld [smem:[#allocation31_spill]] }
  0x79   :  { %s1573_s13 = sld [smem:[#allocation32_spill]]  ;;  %v295_v35 = vstv %s1019_s8 }
  0x7a   :  { %s1043_s23 = sld [smem:[#allocation2 + $0xf]]  ;;  %v205_v24 = vstv %s1568_s10 }
  0x7b   :  { %s1575_s11 = sld [smem:[#allocation34_spill]]  ;;  %v298_v0 = vstv %s1029_s7 }
  0x7c   :  { %s1052_s28 = sld [smem:[#allocation2 + $0x10]]  ;;  %v208_v26 = vstv %s1569_s30 }
  0x7d   :  { %1571 = sst [smem:[#allocation22_spill]] %s1037_s29 }
  0x7e   :  { %s1576_s2 = sld [smem:[#allocation35_spill]]  ;;  %v220_v30 = vstv %s1572_s4 }
  0x7f   :  { %s1057_s17 = sld [smem:[#allocation2 + $0x8f]]  ;;  %v223_v31 = vstv %s1573_s13 }
  0x80   :  { %s1578_s19 = sld [smem:[#allocation37_spill]]  ;;  %v308_v23 = vstv %s1043_s23 }
  0x81   :  { %s1065_s14 = sld [smem:[#allocation2 + $0x10f]]  ;;  %v235_v44 = vstv %s1575_s11  ;;  %v1118_v10 = vmul.f32 %v308_v23, %v964_v36  ;;  %v101_v23 = vmul.f32 %v100_v38, %v1123_v59  ;;  %v176_v38 = vmul.f32 %v175_v14, %v1123_v59 }
  0x82   :  { %s1072_s12 = sld [smem:[#allocation2 + $0x18f]]  ;;  %v323_v9 = vstv %s1052_s28  ;;  %v162_v14 = vadd.f32 %v161_v32, %v1014_v4  ;;  %v134_v4 = vadd.f32 %v133_v50, %v132_v28 }
  0x83   :  { %s1086_s3 = sld [smem:[#allocation2 + $0x11]]  ;;  %v1128_v16 = vmul.f32 %v323_v9, %v964_v36  ;;  %v146_v9 = vmul.f32 %v145_v58, %v1123_v59  ;;  %v102_v2 = vadd.f32 %v101_v23, %v990_v53  ;;  %v117_v58 = vadd.f32 %v116_v60, %v993_v54 }
  0x84   :  { %v238_v47 = vstv %s1576_s2  ;;  %s1099_s22 = sld [smem:[#allocation2 + $0x90]]  ;;  %v89_v53 = vadd.f32 %v88_v33, %v87_v49  ;;  %v164_v50 = vadd.f32 %v163_v6, %v162_v14  ;;  %v236_v23 = vmul.f32 %v235_v44, %v1123_v59 }
  0x85   :  { %s1105_s0 = sld [smem:[#allocation2 + $0x110]]  ;;  %v310_v27 = vstv %s1057_s17  ;;  %v147_v5 = vadd.f32 %v146_v9, %v1002_v57  ;;  %v104_v54 = vadd.f32 %v103_v39, %v102_v2  ;;  %v119_v56 = vadd.f32 %v118_v43, %v117_v58 }
  0x86   :  { %v253_v8 = vstv %s1578_s19  ;;  %s1113_s27 = sld [smem:[#allocation2 + $0x190]]  ;;  %v177_v57 = vadd.f32 %v176_v38, %v1026_v12  ;;  %714 = vtanh.f32 %v89_v53  ;;  %v206_v39 = vmul.f32 %v205_v24, %v1123_v59 }
  0x87   :  { %1579 = sst [smem:[#allocation28_spill]] %s1065_s14  ;;  %v313_v21 = vstv %s1065_s14  ;;  %v149_v33 = vadd.f32 %v148_v61, %v147_v5  ;;  %v221_v43 = vmul.f32 %v220_v30, %v1123_v59  ;;  %716 = vtanh.f32 %v104_v54 }
  0x88   :  { %1580 = sst [smem:[#allocation29_spill]] %s1072_s12  ;;  %v192_v12 = vadd.f32 %v191_v20, %v1035_v17  ;;  %718 = vtanh.f32 %v119_v56  ;;  %v179_v61 = vadd.f32 %v178_v15, %v177_v57  ;;  %v207_v24 = vadd.f32 %v206_v39, %v1048_v22 }
  0x89   :  { %s1130_s28 = sld [smem:[#allocation2 + $0x91]]  ;;  %v338_v42 = vstv %s1086_s3  ;;  %v251_v30 = vmul.f32 %v250_v63, %v1123_v59  ;;  %720 = vtanh.f32 %v134_v4  ;;  %v266_v6 = vmul.f32 %v265_v11, %v1123_v59 }
  0x8a   :  { %s1144_s12 = sld [smem:[#allocation2 + $0x111]]  ;;  %v325_v48 = vstv %s1099_s22  ;;  %v1186_v60 = vmul.f32 %v338_v42, %v964_v36  ;;  %722 = vtanh.f32 %v149_v33  ;;  %v222_v15 = vadd.f32 %v221_v43, %v1060_v29 }
  0x8b   :  { %s1155_s21 = sld [smem:[#allocation2 + $0x191]]  ;;  %v328_v7 = vstv %s1105_s0  ;;  %v281_v22 = vmul.f32 %v280_v37, %v1123_v59  ;;  %724 = vtanh.f32 %v164_v50  ;;  %v194_v63 = vadd.f32 %v193_v19, %v192_v12 }
  0x8c   :  { %s1162_s9 = sld [smem:[#allocation2 + $0x12]]  ;;  %v331_v18 = vstv %s1113_s27  ;;  %v237_v11 = vadd.f32 %v236_v23, %v1068_v41  ;;  %726 = vtanh.f32 %v179_v61  ;;  %v209_v29 = vadd.f32 %v208_v26, %v207_v24 }
  0x8d   :  { %s1170_s3 = sld [smem:[#allocation2 + $0x92]]  ;;  %v252_v37 = vadd.f32 %v251_v30, %v1077_v55  ;;  %v296_v9 = vmul.f32 %v295_v35, %v1123_v59  ;;  %v267_v19 = vadd.f32 %v266_v6, %v1089_v13  ;;  %v311_v41 = vmul.f32 %v310_v27, %v1123_v59 }
  0x8e   :  { %s1179_s14 = sld [smem:[#allocation2 + $0x112]]  ;;  %v224_v26 = vadd.f32 %v223_v31, %v222_v15  ;;  %v282_v55 = vadd.f32 %v281_v22, %v1096_v3  ;;  %728 = vtanh.f32 %v194_v63  ;;  %v239_v13 = vadd.f32 %v238_v47, %v237_v11 }
  0x8f   :  { %s1188_s6 = sld [smem:[#allocation2 + $0x192]]  ;;  %v340_v17 = vstv %s1130_s28  ;;  %730 = vtanh.f32 %v209_v29  ;;  %v254_v2 = vadd.f32 %v253_v8, %v252_v37  ;;  %v297_v31 = vadd.f32 %v296_v9, %v1110_v52 }
  0x90   :  { %s1198_s20 = sld [smem:[#allocation2 + $0x13]]  ;;  %v343_v44 = vstv %s1144_s12  ;;  %v326_v3 = vmul.f32 %v325_v48, %v1123_v59  ;;  %v269_v58 = vadd.f32 %v268_v25, %v267_v19  ;;  %v312_v47 = vadd.f32 %v311_v41, %v1118_v10 }
  0x91   :  { %s1206_s24 = sld [smem:[#allocation2 + $0x93]]  ;;  %v346_v1 = vstv %s1155_s21  ;;  %v341_v28 = vmul.f32 %v340_v17, %v1123_v59  ;;  %732 = vtanh.f32 %v224_v26  ;;  %v284_v52 = vadd.f32 %v283_v46, %v282_v55 }
  0x92   :  { %s1219_s4 = sld [smem:[#allocation2 + $0x113]]  ;;  %v353_v20 = vstv %s1162_s9  ;;  %734 = vtanh.f32 %v239_v13  ;;  %v299_v46 = vadd.f32 %v298_v0, %v297_v31  ;;  %v327_v57 = vadd.f32 %v326_v3, %v1128_v16 }
  0x93   :  { %s1226_s16 = sld [smem:[#allocation2 + $0x14]]  ;;  %v354_v32 = vmul.f32 %v353_v20, %v964_v36  ;;  %v355_v38 = vstv %s1170_s3  ;;  %v715_v25 = vpop.eup %714  ;;  %736 = vtanh.f32 %v254_v2  ;;  %v314_v39 = vadd.f32 %v313_v21, %v312_v47 }
  0x94   :  { %s1232_s18 = sld [smem:[#allocation2 + $0x94]]  ;;  %v358_v35 = vstv %s1179_s14  ;;  %v356_v8 = vmul.f32 %v355_v38, %v1123_v59  ;;  %v717_v54 = vpop.eup %716  ;;  %v92_v56 = vmul.f32 %v715_v25, %v91_v34  ;;  %738 = vtanh.f32 %v269_v58 }
  0x95   :  { %s1240_s26 = sld [smem:[#allocation2 + $0x193]]  ;;  %v361_v27 = vstv %s1188_s6  ;;  %v719_v4 = vpop.eup %718  ;;  %v107_v33 = vmul.f32 %v717_v54, %v106_v40  ;;  %v342_v43 = vadd.f32 %v341_v28, %v1186_v60  ;;  %740 = vtanh.f32 %v284_v52 }
  0x96   :  { %s1248_s30 = sld [smem:[#allocation2 + $0x114]]  ;;  %v368_v42 = vstv %s1198_s20  ;;  %v721_v34 = vpop.eup %720  ;;  %v122_v0 = vmul.f32 %v719_v4, %v121_v45  ;;  %742 = vtanh.f32 %v299_v46  ;;  %v357_v61 = vadd.f32 %v356_v8, %v354_v32 }
  0x97   :  { %s1255_s8 = sld [smem:[#allocation2 + $0x15]]  ;;  %v370_v49 = vstv %s1206_s24  ;;  %v369_v5 = vmul.f32 %v368_v42, %v964_v36  ;;  %v723_v40 = vpop.eup %722  ;;  %v108_v21 = vadd.f32 %v107_v33, %v92_v56  ;;  %v137_v60 = vmul.f32 %v721_v34, %v136_v51 }
  0x98   :  { %s1261_s11 = sld [smem:[#allocation2 + $0x95]]  ;;  %v373_v14 = vstv %s1219_s4  ;;  %v371_v10 = vmul.f32 %v370_v49, %v1123_v59  ;;  %v725_v45 = vpop.eup %724  ;;  %v152_v15 = vmul.f32 %v723_v40, %v151_v62  ;;  %v329_v51 = vadd.f32 %v328_v7, %v327_v57 }
  0x99   :  { %s1269_s13 = sld [smem:[#allocation2 + $0x194]]  ;;  %v383_v48 = vstv %s1226_s16  ;;  %v727_v6 = vpop.eup %726  ;;  %v123_v17 = vadd.f32 %v122_v0, %v108_v21  ;;  %744 = vtanh.f32 %v314_v39  ;;  %v344_v20 = vadd.f32 %v343_v44, %v342_v43 }
  0x9a   :  { %s1276_s19 = sld [smem:[#allocation2 + $0x16]]  ;;  %v385_v53 = vstv %s1232_s18  ;;  %v384_v16 = vmul.f32 %v383_v48, %v964_v36  ;;  %v372_v24 = vadd.f32 %v371_v10, %v369_v5  ;;  %v359_v32 = vadd.f32 %v358_v35, %v357_v61 }
  0x9b   :  { %s1282_s22 = sld [smem:[#allocation2 + $0x115]]  ;;  %v386_v50 = vmul.f32 %v385_v53, %v1123_v59  ;;  %v376_v30 = vstv %s1240_s26  ;;  %v138_v29 = vadd.f32 %v137_v60, %v123_v17  ;;  %v729_v19 = vpop.eup %728  ;;  %746 = vtanh.f32 %v329_v51 }
  0x9c   :  { %s1287_s15 = sld [smem:[#allocation2 + $0x96]]  ;;  %v388_v38 = vstv %s1248_s30  ;;  %v731_v55 = vpop.eup %730  ;;  %v374_v31 = vadd.f32 %v373_v14, %v372_v24  ;;  %748 = vtanh.f32 %v344_v20 }
  0x9d   :  { %s1294_s9 = sld [smem:[#allocation2 + $0x17]]  ;;  %v398_v12 = vstv %s1255_s8  ;;  %v387_v9 = vadd.f32 %v386_v50, %v384_v16  ;;  %v153_v42 = vadd.f32 %v152_v15, %v138_v29  ;;  %750 = vtanh.f32 %v359_v32 }
  0x9e   :  { %s1301_s5 = sld [smem:[#allocation2 + $0x97]]  ;;  %v400_v23 = vstv %s1261_s11  ;;  %v399_v63 = vmul.f32 %v398_v12, %v964_v36  ;;  %v733_v58 = vpop.eup %732  ;;  %752 = vtanh.f32 %v374_v31 }
  0x9f   :  { %s1307_s3 = sld [smem:[#allocation2 + $0x116]]  ;;  %v401_v11 = vmul.f32 %v400_v23, %v1123_v59  ;;  %v389_v52 = vadd.f32 %v388_v38, %v387_v9  ;;  %v735_v8 = vpop.eup %734  ;;  %v391_v33 = vstv %s1269_s13 }
  0xa0   :  { %s1313_s23 = sld [smem:[#allocation2 + $0x117]]  ;;  %v413_v22 = vstv %s1276_s19  ;;  %v737_v53 = vpop.eup %736 }
  0xa1   :  { %s1601_s29 = sld [smem:[#allocation21_spill]]  ;;  %v414_v26 = vmul.f32 %v413_v22, %v964_v36  ;;  %v402_v3 = vadd.f32 %v401_v11, %v399_v63  ;;  %v403_v35 = vstv %s1282_s22  ;;  %v739_v4 = vpop.eup %738  ;;  %754 = vtanh.f32 %v389_v52 }
  0xa2   :  { %s1316_s20 = sld [smem:[#allocation2 + $0x18]]  ;;  %v415_v7 = vstv %s1287_s15  ;;  %v741_v34 = vpop.eup %740 }
  0xa3   :  { %s1602_s24 = sld [smem:[#allocation24_spill]]  ;;  %v416_v13 = vmul.f32 %v415_v7, %v1123_v59  ;;  %v428_v49 = vstv %s1294_s9  ;;  %v404_v39 = vadd.f32 %v403_v35, %v402_v3  ;;  %v743_v61 = vpop.eup %742 }
  0xa4   :  { %s1323_s10 = sld [smem:[#allocation2 + $0x98]]  ;;  %v430_v2 = vstv %s1301_s5  ;;  %v429_v14 = vmul.f32 %v428_v49, %v964_v36 }
  0xa5   :  { %s1329_s16 = sld [smem:[#allocation2 + $0x118]]  ;;  %v431_v48 = vmul.f32 %v430_v2, %v1123_v59  ;;  %v417_v56 = vadd.f32 %v416_v13, %v414_v26  ;;  %v418_v43 = vstv %s1307_s3  ;;  %756 = vtanh.f32 %v404_v39 }
  0xa6   :  { %s1334_s0 = sld [smem:[#allocation2 + $0x19]]  ;;  %v433_v17 = vstv %s1313_s23  ;;  %v745_v11 = vpop.eup %744 }
  0xa7   :  { %v1603_v62 = vstv %s1601_s29  ;;  %s1605_s12 = sld [smem:[#allocation27_spill]]  ;;  %v432_v60 = vadd.f32 %v431_v48, %v429_v14 }
  0xa8   :  { %v167_v37 = vmul.f32 %v725_v45, %v1603_v62  ;;  %s1342_s18 = sld [smem:[#allocation2 + $0x99]]  ;;  %v443_v46 = vstv %s1316_s20 }
  0xa9   :  { %v1604_v41 = vstv %s1602_s24  ;;  %s1606_s8 = sld [smem:[#allocation30_spill]]  ;;  %v444_v12 = vmul.f32 %v443_v46, %v964_v36  ;;  %v434_v32 = vadd.f32 %v433_v17, %v432_v60 }
  0xaa   :  { %v182_v44 = vmul.f32 %v727_v6, %v1604_v41  ;;  %s1347_s11 = sld [smem:[#allocation2 + $0x119]]  ;;  %v168_v47 = vadd.f32 %v167_v37, %v153_v42  ;;  %v445_v57 = vstv %s1323_s10  ;;  %v419_v6 = vadd.f32 %v418_v43, %v417_v56 }
  0xab   :  { %s1352_s14 = sld [smem:[#allocation2 + $0x1a]]  ;;  %v446_v23 = vmul.f32 %v445_v57, %v1123_v59  ;;  %v448_v42 = vstv %s1329_s16 }
  0xac   :  { %s1356_s30 = sld [smem:[#allocation2 + $0x9a]]  ;;  %v183_v54 = vadd.f32 %v182_v44, %v168_v47  ;;  %v458_v45 = vstv %s1334_s0  ;;  %758 = vtanh.f32 %v419_v6 }
  0xad   :  { %v1607_v28 = vstv %s1605_s12  ;;  %s1609_s4 = sld [smem:[#allocation33_spill]]  ;;  %v459_v20 = vmul.f32 %v458_v45, %v964_v36  ;;  %v447_v38 = vadd.f32 %v446_v23, %v444_v12  ;;  %760 = vtanh.f32 %v434_v32 }
  0xae   :  { %v197_v5 = vmul.f32 %v729_v19, %v1607_v28  ;;  %s1362_s2 = sld [smem:[#allocation2 + $0x11a]]  ;;  %v460_v15 = vstv %s1342_s18 }
  0xaf   :  { %v1608_v25 = vstv %s1606_s8  ;;  %s1610_s19 = sld [smem:[#allocation36_spill]]  ;;  %v461_v63 = vmul.f32 %v460_v15, %v1123_v59 }
  0xb0   :  { %v212_v10 = vmul.f32 %v731_v55, %v1608_v25  ;;  %s1366_s17 = sld [smem:[#allocation2 + $0x1b]]  ;;  %v198_v0 = vadd.f32 %v197_v5, %v183_v54  ;;  %v463_v28 = vstv %s1347_s11  ;;  %v449_v25 = vadd.f32 %v448_v42, %v447_v38 }
  0xb1   :  { %s1370_s22 = sld [smem:[#allocation2 + $0x9b]]  ;;  %v473_v19 = vstv %s1352_s14  ;;  %v462_v31 = vadd.f32 %v461_v63, %v459_v20 }
  0xb2   :  { %s1612_s1 = sld [smem:[#allocation38_spill]]  ;;  %v213_v24 = vadd.f32 %v212_v10, %v198_v0  ;;  %v474_v26 = vmul.f32 %v473_v19, %v964_v36  ;;  %v475_v13 = vstv %s1356_s30  ;;  %762 = vtanh.f32 %v449_v25 }
  0xb3   :  { %v1611_v16 = vstv %s1609_s4  ;;  %s1376_s28 = sld [smem:[#allocation2 + $0x11b]]  ;;  %v476_v3 = vmul.f32 %v475_v13, %v1123_v59  ;;  %v464_v57 = vadd.f32 %v463_v28, %v462_v31 }
  0xb4   :  { %v227_v50 = vmul.f32 %v733_v58, %v1611_v16  ;;  %s1614_s15 = sld [smem:[#allocation39_spill]]  ;;  %v747_v58 = vpop.eup %746  ;;  %v478_v54 = vstv %s1362_s2 }
  0xb5   :  { %v1613_v40 = vstv %s1610_s19  ;;  %s1615_s25 = sld [smem:[#allocation40_spill]]  ;;  %v477_v10 = vadd.f32 %v476_v3, %v474_v26  ;;  %v332_v60 = vmul.f32 %v747_v58, %v331_v18  ;;  %764 = vtanh.f32 %v464_v57 }
  0xb6   :  { %v242_v21 = vmul.f32 %v735_v8, %v1613_v40  ;;  %s1381_s9 = sld [smem:[#allocation2 + $0x1c]]  ;;  %v228_v29 = vadd.f32 %v227_v50, %v213_v24  ;;  %v488_v35 = vstv %s1366_s17  ;;  %v749_v8 = vpop.eup %748 }
  0xb7   :  { %s1616_s5 = sld [smem:[#allocation22_spill]]  ;;  %v489_v5 = vmul.f32 %v488_v35, %v964_v36  ;;  %v490_v52 = vstv %s1370_s22  ;;  %v751_v48 = vpop.eup %750  ;;  %v347_v12 = vmul.f32 %v749_v8, %v346_v1  ;;  %v479_v23 = vadd.f32 %v478_v54, %v477_v10 }
  0xb8   :  { %s1385_s7 = sld [smem:[#allocation2 + $0x9c]]  ;;  %v1617_v51 = vstv %s1612_s1  ;;  %v243_v55 = vadd.f32 %v242_v21, %v228_v29  ;;  %v491_v14 = vmul.f32 %v490_v52, %v1123_v59  ;;  %v362_v17 = vmul.f32 %v751_v48, %v361_v27 }
  0xb9   :  { %v257_v22 = vmul.f32 %v737_v53, %v1617_v51  ;;  %s1391_s3 = sld [smem:[#allocation2 + $0x1d]]  ;;  %v493_v16 = vstv %s1376_s28  ;;  %766 = vtanh.f32 %v479_v23 }
  0xba   :  { %s1618_s29 = sld [smem:[#allocation29_spill]]  ;;  %v1619_v62 = vstv %s1614_s15 }
  0xbb   :  { %v272_v37 = vmul.f32 %v739_v4, %v1619_v62  ;;  %v1620_v9 = vstv %s1615_s25  ;;  %s1398_s23 = sld [smem:[#allocation2 + $0x9d]]  ;;  %v258_v47 = vadd.f32 %v257_v22, %v243_v55  ;;  %v492_v4 = vadd.f32 %v491_v14, %v489_v5 }
  0xbc   :  { %v287_v7 = vmul.f32 %v741_v34, %v1620_v9  ;;  %s1403_s20 = sld [smem:[#allocation2 + $0x11c]]  ;;  %v503_v56 = vstv %s1381_s9  ;;  %v753_v34 = vpop.eup %752 }
  0xbd   :  { %v1621_v41 = vstv %s1616_s5  ;;  %s1407_s24 = sld [smem:[#allocation2 + $0x11d]]  ;;  %v273_v53 = vadd.f32 %v272_v37, %v258_v47  ;;  %v504_v39 = vmul.f32 %v503_v56, %v964_v36  ;;  %v755_v21 = vpop.eup %754  ;;  %v494_v18 = vadd.f32 %v493_v16, %v492_v4 }
  0xbe   :  { %v302_v44 = vmul.f32 %v743_v61, %v1621_v41  ;;  %s1413_s10 = sld [smem:[#allocation2 + $0x1e]]  ;;  %v505_v46 = vstv %s1385_s7  ;;  %v757_v15 = vpop.eup %756  ;;  %v392_v42 = vmul.f32 %v755_v21, %v391_v33 }
  0xbf   :  { %s1418_s16 = sld [smem:[#allocation2 + $0x9e]]  ;;  %v506_v43 = vmul.f32 %v505_v46, %v1123_v59  ;;  %v288_v0 = vadd.f32 %v287_v7, %v273_v53  ;;  %v518_v50 = vstv %s1391_s3  ;;  %v759_v19 = vpop.eup %758  ;;  %768 = vtanh.f32 %v494_v18 }
  0xc0   :  { %v1622_v49 = vstv %s1618_s29  ;;  %s1421_s0 = sld [smem:[#allocation2 + $0x11e]]  ;;  %v519_v24 = vmul.f32 %v518_v50, %v964_v36 }
  0xc1   :  { %v317_v2 = vmul.f32 %v745_v11, %v1622_v49  ;;  %s1426_s12 = sld [smem:[#allocation2 + $0x1f]]  ;;  %v520_v40 = vstv %s1398_s23  ;;  %v303_v45 = vadd.f32 %v302_v44, %v288_v0  ;;  %v507_v61 = vadd.f32 %v506_v43, %v504_v39 }
  0xc2   :  { %s1430_s18 = sld [smem:[#allocation2 + $0x9f]]  ;;  %v521_v6 = vmul.f32 %v520_v40, %v1123_v59  ;;  %v508_v1 = vstv %s1403_s20  ;;  %v377_v11 = vmul.f32 %v753_v34, %v376_v30 }
  0xc3   :  { %s1432_s8 = sld [smem:[#allocation2 + $0x195]]  ;;  %v318_v51 = vadd.f32 %v317_v2, %v303_v45  ;;  %v523_v29 = vstv %s1407_s24  ;;  %v509_v9 = vadd.f32 %v508_v1, %v507_v61  ;;  %v761_v2 = vpop.eup %760 }
  0xc4   :  { %s1441_s11 = sld [smem:[#allocation2 + $0x11f]]  ;;  %v522_v22 = vadd.f32 %v521_v6, %v519_v24  ;;  %v533_v20 = vstv %s1413_s10  ;;  %v763_v33 = vpop.eup %762 }
  0xc5   :  { %s1447_s27 = sld [smem:[#allocation2 + $0x196]]  ;;  %v535_v63 = vstv %s1418_s16  ;;  %v534_v27 = vmul.f32 %v533_v20, %v964_v36  ;;  %v333_v37 = vadd.f32 %v332_v60, %v318_v51  ;;  %770 = vtanh.f32 %v509_v9  ;;  %v765_v25 = vpop.eup %764 }
  0xc6   :  { %s1454_s21 = sld [smem:[#allocation2 + $0x197]]  ;;  %v536_v62 = vmul.f32 %v535_v63, %v1123_v59  ;;  %v538_v44 = vstv %s1421_s0  ;;  %v524_v26 = vadd.f32 %v523_v29, %v522_v22  ;;  %v767_v56 = vpop.eup %766 }
  0xc7   :  { %v548_v7 = vstv %s1426_s12  ;;  %s1460_s6 = sld [smem:[#allocation2 + $0x198]]  ;;  %v348_v38 = vadd.f32 %v347_v12, %v333_v37 }
  0xc8   :  { %v537_v41 = vadd.f32 %v536_v62, %v534_v27  ;;  %v549_v30 = vmul.f32 %v548_v7, %v964_v36  ;;  %v550_v32 = vstv %s1430_s18  ;;  %s1469_s26 = sld [smem:[#allocation2 + $0x199]]  ;;  %772 = vtanh.f32 %v524_v26 }
  0xc9   :  { %v551_v55 = vmul.f32 %v550_v32, %v1123_v59  ;;  %v406_v13 = vstv %s1432_s8  ;;  %v363_v31 = vadd.f32 %v362_v17, %v348_v38  ;;  %s683_s14 = sld [smem:[#allocation2 + $0x19a]] }
  0xca   :  { %v553_v49 = vstv %s1441_s11  ;;  %v539_v3 = vadd.f32 %v538_v44, %v537_v41  ;;  %v407_v47 = vmul.f32 %v757_v15, %v406_v13  ;;  %s687_s13 = sld [smem:[#allocation2 + $0x19b]] }
  0xcb   :  { %v552_v35 = vadd.f32 %v551_v55, %v549_v30  ;;  %v421_v36 = vstv %s1447_s27  ;;  %v378_v58 = vadd.f32 %v377_v11, %v363_v31  ;;  %s691_s30 = sld [smem:[#allocation2 + $0x19c]] }
  0xcc   :  { %v436_v28 = vstv %s1454_s21  ;;  %v422_v52 = vmul.f32 %v759_v19, %v421_v36  ;;  %774 = vtanh.f32 %v539_v3  ;;  %s695_s4 = sld [smem:[#allocation2 + $0x19d]]  ;;  %v769_v39 = vpop.eup %768 }
  0xcd   :  { %v554_v59 = vadd.f32 %v553_v49, %v552_v35  ;;  %v393_v5 = vadd.f32 %v392_v42, %v378_v58  ;;  %v451_v8 = vstv %s1460_s6  ;;  %v437_v14 = vmul.f32 %v761_v2, %v436_v28  ;;  %s699_s2 = sld [smem:[#allocation2 + $0x19e]] }
  0xce   :  { %v466_v48 = vstv %s1469_s26  ;;  %v452_v54 = vmul.f32 %v763_v33, %v451_v8  ;;  %s703_s19 = sld [smem:[#allocation2 + $0x19f]] }
  0xcf   :  { %v408_v10 = vadd.f32 %v407_v47, %v393_v5  ;;  %776 = vtanh.f32 %v554_v59  ;;  %v481_v46 = vstv %s683_s14  ;;  %v467_v4 = vmul.f32 %v765_v25, %v466_v48  ;;  %s704_s17 = sld [smem:[#allocation2 + $0x200]] }
  0xd0   :  { %v496_v43 = vstv %s687_s13  ;;  %v482_v0 = vmul.f32 %v767_v56, %v481_v46  ;;  %s1623_s28 = sld [smem:[#allocation41_spill]] }
  0xd1   :  { %v423_v53 = vadd.f32 %v422_v52, %v408_v10  ;;  %v511_v50 = vstv %s691_s30  ;;  %v497_v21 = vmul.f32 %v769_v39, %v496_v43 }
  0xd2   :  { %v771_v16 = vpop.eup %770  ;;  %v526_v12 = vstv %s695_s4 }
  0xd3   :  { %v438_v57 = vadd.f32 %v437_v14, %v423_v53  ;;  %v512_v45 = vmul.f32 %v771_v16, %v511_v50  ;;  %v541_v24 = vstv %s699_s2 }
  0xd4   :  { %v556_v1 = vstv %s703_s19 }
  0xd5   :  { %v453_v34 = vadd.f32 %v452_v54, %v438_v57  ;;  %v773_v60 = vpop.eup %772  ;;  %v560_v11 = vstv %s704_s17 }
  0xd6   :  { %v527_v17 = vmul.f32 %v773_v60, %v526_v12 }
  0xd7   :  { %v468_v40 = vadd.f32 %v467_v4, %v453_v34 }
  0xd9   :  { %v483_v23 = vadd.f32 %v482_v0, %v468_v40  ;;  %v775_v61 = vpop.eup %774 }
  0xda   :  { %v542_v51 = vmul.f32 %v775_v61, %v541_v24 }
  0xdb   :  { %v498_v6 = vadd.f32 %v497_v21, %v483_v23 }
  0xdc   :  { %v777_v18 = vpop.eup %776 }
  0xdd   :  { %v513_v15 = vadd.f32 %v512_v45, %v498_v6  ;;  %v557_v20 = vmul.f32 %v777_v18, %v556_v1 }
  0xdf   :  { %v528_v22 = vadd.f32 %v527_v17, %v513_v15 }
  0xe1   :  { %v543_v63 = vadd.f32 %v542_v51, %v528_v22 }
  0xe3   :  { %v558_v29 = vadd.f32 %v557_v20, %v543_v63 }
  0xe5   :  { %v561_v27 = vadd.f32 %v560_v11, %v558_v29 }
  0xe7   :  { %v705_v62 = vmul.f32 -1.442695, %v561_v27 }
  0xe9   :  { %778 = vpow2.f32 %v705_v62 }
  0xf6   :  { %v779_v37 = vpop.eup %778 }
  0xf7   :  { %v565_v9 = vadd.f32 1.0, %v779_v37 }
  0xf9   :  { %780 = vrcp.f32 %v565_v9 }
 0x106   :  { %v781_v7 = vpop.eup %780 }
 0x107   :  { %568 = vst [vmem:[%s1623_s28] sm:$0xff] %v781_v7 }
 0x108   :  { %573 = vsyncpa [#allocation3], 1 }

</bundles_post_ra>
